<compile_context>
chip_gen: v7x
topology: tpu7x:2x2x1
jax: 0.10.0
libtpu: 0.0.40
codegen_flags: <defaults>
</compile_context>

<pallas_src>
import functools
import math

import jax
import jax.numpy as jnp
from jax import lax
from jax.experimental import pallas as pl
from jax.experimental.pallas import tpu as pltpu

LN_EPS = 1e-5   # torch.nn.LayerNorm default
LANE = 128      # TPU vreg lane width


def _layer_norm(h, gamma, beta):
    mu = jnp.mean(h, axis=-1, keepdims=True)
    var = jnp.mean((h - mu) ** 2, axis=-1, keepdims=True)
    return (h - mu) * lax.rsqrt(var + LN_EPS) * gamma + beta


# ----------------------------------------------------------------------------
# Fully fused forward kernel.
# One grid step covers `bblk` batch elements (bblk = 1 on dual-TC chips,
# bblk = B on single-TC chips).  All parameters are VMEM-resident slabs.
# ----------------------------------------------------------------------------
def _fused_forward_kernel(tok_ref, emb_ref, pe_ref, wmat_ref, vec_ref,
                          wfc_ref, bfc_ref, o_ref,
                          *, num_layers, num_heads, scale, bblk):
    emb = emb_ref[...]            # (Vocab, E) renormalized embedding table
    pe = pe_ref[...]              # (S, E)
    wmat = wmat_ref[...]          # (3L, E, E)  [wq, wf1, wf2] per layer
    vecs = vec_ref[...]           # (7L, E)     [bq,g1,b1,bf1,bf2,g2,b2] per layer
    wfc = wfc_ref[...]            # (E, Vpad)   lane-padded fc1 weight
    bfc = bfc_ref[...]            # (1, Vpad)   lane-padded fc1 bias
    tok = tok_ref[...]            # (bblk, S, 1) int32 token ids

    Vocab, E = emb.shape
    S = pe.shape[0]
    H = num_heads
    Dh = E // H

    # Hoisted constants shared by every layer and batch element.
    row = lax.broadcasted_iota(jnp.int32, (S, S), 0)
    col = lax.broadcasted_iota(jnp.int32, (S, S), 1)
    causal = (col > row)[None, :, :]                      # (1, S, S)
    neg_inf = jnp.float32(float("-inf"))
    lane_v = lax.broadcasted_iota(jnp.int32, (S, Vocab), 1)

    for b in range(bblk):                                 # static unroll (<= B)
        # --- embedding lookup fused in-kernel as an exact one-hot matmul ---
        onehot = (tok[b] == lane_v).astype(jnp.float32)   # (S, Vocab)
        x = jnp.dot(onehot, emb, preferred_element_type=jnp.float32,
                    precision=lax.Precision.HIGHEST) + pe  # (S, E), PE add fused

        for l in range(num_layers):                       # static unroll
            wq, wf1, wf2 = wmat[3 * l + 0], wmat[3 * l + 1], wmat[3 * l + 2]
            v0 = 7 * l
            bq  = vecs[v0 + 0:v0 + 1]
            g1  = vecs[v0 + 1:v0 + 2]
            b1  = vecs[v0 + 2:v0 + 3]
            bf1 = vecs[v0 + 3:v0 + 4]
            bf2 = vecs[v0 + 4:v0 + 5]
            g2  = vecs[v0 + 5:v0 + 6]
            b2  = vecs[v0 + 6:v0 + 7]

            # Attention projection. Reference quirk: linearQ is used for
            # Q, K AND V, so k == v == q (never materialized separately).
            q = jnp.dot(x, wq, preferred_element_type=jnp.float32) + bq  # (S, E)

            # Head split WITHOUT lane-splitting reshapes: 2-D transpose, then a
            # tile-aligned split of the leading dim (Dh == 8 == sublane tile).
            qh = jnp.transpose(q).reshape(H, Dh, S)       # (H, Dh, S)

            # Batched QK^T over heads; attention scale folded into the query.
            s = jnp.einsum('hdq,hdk->hqk', qh * scale, qh,
                           preferred_element_type=jnp.float32)   # (H, S, S)
            s = jnp.where(causal, neg_inf, s)
            s = s - jnp.max(s, axis=-1, keepdims=True)
            p = jnp.exp(s)
            # Softmax denominator via approx reciprocal on the (idle) EUP slot.
            p = p * pl.reciprocal(jnp.sum(p, axis=-1, keepdims=True), approx=True)

            # Batched PV (V == q).  Output is produced transposed so merging
            # heads back to (S, E) is a tile-aligned reshape + one 2-D transpose
            # instead of H-1 lane concatenates.
            ot = jnp.einsum('hdk,hqk->hdq', qh, p,
                            preferred_element_type=jnp.float32)  # (H, Dh, S)
            attn = jnp.transpose(ot.reshape(E, S))               # (S, E)

            # residual + LayerNorm 1 (dropout1 = eval-mode identity)
            h1 = _layer_norm(x + attn, g1, b1)

            # feed-forward: Linear -> SiLU -> (dropout noop) -> Linear
            f = jnp.dot(h1, wf1, preferred_element_type=jnp.float32) + bf1
            f = f * jax.nn.sigmoid(f)                     # SiLU
            f = jnp.dot(f, wf2, preferred_element_type=jnp.float32) + bf2

            # residual + LayerNorm 2 (dropout2 = eval-mode identity)
            x = _layer_norm(h1 + f, g2, b2)

        # Final fc1 into the lane-padded (S, Vpad) slab: one unmasked,
        # lane-dense HBM store per batch element.
        o_ref[b] = jnp.dot(x, wfc, preferred_element_type=jnp.float32) + bfc


def _multi_tensorcore_device():
    """Best-effort check for >1 TensorCore per chip (v7x dual-TC, v4/v5p)."""
    try:
        kind = jax.devices()[0].device_kind.lower()
    except Exception:
        return False
    return any(tag in kind for tag in ("v7", "7x", "v4", "v5p"))


def transformer_model(tokens, params, num_heads):
    """Forward pass matching TransformerModel.forward(src)."""
    emb = params["embedding"].astype(jnp.float32)
    # nn.Embedding(max_norm=1.0): rows with L2 norm > 1 are renormalized by
    # 1/(norm + 1e-7) (torch's embedding_renorm_). One-time tiny op, kept in XLA.
    norms = jnp.linalg.norm(emb, axis=-1, keepdims=True)
    emb = jnp.where(norms > 1.0, emb / (norms + 1e-7), emb)

    B, S = tokens.shape
    Vocab, E = emb.shape
    pe = params["pe"][:S].astype(jnp.float32)             # (S, E)

    # Pad fc1 to a 128-lane-multiple output width so the kernel's only HBM
    # store is unmasked / lane-dense; slice back to Vocab below.
    w_fc, b_fc = params["w_fc1"], params["b_fc1"]
    Vout = w_fc.shape[1]
    Vpad = max(LANE, ((Vout + LANE - 1) // LANE) * LANE)
    w_pad = jnp.zeros((E, Vpad), jnp.float32).at[:, :Vout].set(w_fc)
    b_pad = jnp.zeros((1, Vpad), jnp.float32).at[:, :Vout].set(b_fc)

    # Pack per-layer params into two slabs (matrix slab + vector slab):
    # a couple of DMA descriptors at kernel start instead of ~24 tiny ones.
    layers = params["layers"]
    L = len(layers)
    wmat = jnp.stack([jnp.asarray(lp[n], jnp.float32)
                      for lp in layers for n in ("wq", "wf1", "wf2")])       # (3L,E,E)
    vecs = jnp.stack([jnp.asarray(lp[n], jnp.float32).reshape(E)
                      for lp in layers
                      for n in ("bq", "g1", "b1", "bf1", "bf2", "g2", "b2")])  # (7L,E)

    tok3 = tokens.astype(jnp.int32).reshape(B, S, 1)

    # Batch blocking: one batch element per grid step on multi-TC chips (v7x)
    # so both TensorCores get work; a single fused grid step on single-TC
    # chips (v5e/v6e) where per-grid-step overhead dominates at this size.
    bblk = 1 if (_multi_tensorcore_device() and B > 1) else B
    nblocks = B // bblk
    sem = "parallel" if nblocks > 1 else "arbitrary"

    scale = float(E) ** (-0.5)              # reference quirk: embed_dim**-0.5
    kernel = functools.partial(_fused_forward_kernel, num_layers=L,
                               num_heads=num_heads, scale=scale, bblk=bblk)

    out_pad = pl.pallas_call(
        kernel,
        out_shape=jax.ShapeDtypeStruct((B, S, Vpad), jnp.float32),
        grid=(nblocks,),
        in_specs=[
            pl.BlockSpec((bblk, S, 1), lambda i: (i, 0, 0)),      # token ids
            pl.BlockSpec((Vocab, E), lambda i: (0, 0)),           # embedding table
            pl.BlockSpec((S, E), lambda i: (0, 0)),               # positional enc
            pl.BlockSpec((3 * L, E, E), lambda i: (0, 0, 0)),     # matrix slab
            pl.BlockSpec((7 * L, E), lambda i: (0, 0)),           # vector slab
            pl.BlockSpec((E, Vpad), lambda i: (0, 0)),            # fc1 weight (padded)
            pl.BlockSpec((1, Vpad), lambda i: (0, 0)),            # fc1 bias (padded)
        ],
        out_specs=pl.BlockSpec((bblk, S, Vpad), lambda i: (i, 0, 0)),
        compiler_params=pltpu.CompilerParams(dimension_semantics=(sem,)),
    )(tok3, emb, pe, wmat, vecs, w_pad, b_pad)

    return out_pad[:, :, :Vout]                            # drop lane padding


# ----------------------------------------------------------------------------
# Deterministic in-script parameters
# ----------------------------------------------------------------------------
def init_params(key, vocab_size, embed_dim, num_layers, max_len):
    keys = jax.random.split(key, num_layers + 2)
    params = {}
    params["embedding"] = jax.random.normal(
        keys[0], (vocab_size, embed_dim), jnp.float32)

    # positional-encoding buffer (matches PositionalEncoding, base 1000.0)
    position = jnp.arange(max_len, dtype=jnp.float32)[:, None]
    div_term = jnp.exp(jnp.arange(0, embed_dim, 2, dtype=jnp.float32)
                       * -(math.log(1000.0) / embed_dim))
    pe = jnp.zeros((max_len, embed_dim), jnp.float32)
    pe = pe.at[:, 0::2].set(jnp.sin(position * div_term))
    pe = pe.at[:, 1::2].set(jnp.cos(position * div_term))
    params["pe"] = pe

    ff = embed_dim  # CustomTransformerEncoder is built with ff_hidden_dim=embed_dim
    layers = []
    for l in range(num_layers):
        k = jax.random.split(keys[1 + l], 3)
        layers.append(dict(
            wq=0.05 * jax.random.normal(k[0], (embed_dim, embed_dim), jnp.float32),
            bq=jnp.zeros((1, embed_dim), jnp.float32),
            g1=jnp.ones((1, embed_dim), jnp.float32),
            b1=jnp.zeros((1, embed_dim), jnp.float32),
            wf1=0.05 * jax.random.normal(k[1], (embed_dim, ff), jnp.float32),
            bf1=jnp.zeros((1, ff), jnp.float32),
            wf2=0.05 * jax.random.normal(k[2], (ff, embed_dim), jnp.float32),
            bf2=jnp.zeros((1, embed_dim), jnp.float32),
            g2=jnp.ones((1, embed_dim), jnp.float32),
            b2=jnp.zeros((1, embed_dim), jnp.float32),
        ))
    params["layers"] = layers

    kfc = jax.random.split(keys[-1], 2)
    params["w_fc1"] = 0.05 * jax.random.normal(
        kfc[0], (embed_dim, vocab_size), jnp.float32)
    params["b_fc1"] = jnp.zeros((1, vocab_size), jnp.float32)
    return params


if __name__ == "__main__":
    vocab_size = 16
    embed_dim = 32
    num_heads = 4
    num_encoder_layers = 2
    max_len = 64
    B, S = 2, 8

    key = jax.random.PRNGKey(0)
    k_tok, k_par = jax.random.split(key)
    tokens = jax.random.randint(k_tok, (B, S), 0, vocab_size, dtype=jnp.int32)
    params = init_params(k_par, vocab_size, embed_dim, num_encoder_layers, max_len)

    out = transformer_model(tokens, params, num_heads)
    out = jax.block_until_ready(out)
    assert out.shape == (B, S, vocab_size)
    assert bool(jnp.all(jnp.isfinite(out)))
    print("KERNEL_OK")
</pallas_src>

<mosaic_0001>
module attributes {stable_mosaic.version = 11 : i64} {
  func.func @_fused_forward_kernel(%arg0: i32, %arg1: memref<2x8x1xi32, #tpu.memory_space<vmem>>, %arg2: memref<16x32xf32, #tpu.memory_space<vmem>>, %arg3: memref<8x32xf32, #tpu.memory_space<vmem>>, %arg4: memref<6x32x32xf32, #tpu.memory_space<vmem>>, %arg5: memref<14x32xf32, #tpu.memory_space<vmem>>, %arg6: memref<32x128xf32, #tpu.memory_space<vmem>>, %arg7: memref<1x128xf32, #tpu.memory_space<vmem>>, %arg8: memref<2x8x128xf32, #tpu.memory_space<vmem>>) attributes {dimension_semantics = [#tpu.dimension_semantics<arbitrary>], iteration_bounds = array<i64: 1>, scalar_prefetch = 0 : i64, scratch_operands = 0 : i64, tpu.core_type = #tpu.core_type<tc>, window_params = [{transform_indices = @transform_0, window_bounds = array<i64: 2, 8, 1>}, {pipeline_mode = #tpu.pipeline_mode<synchronous>, transform_indices = @transform_1, window_bounds = array<i64: 16, 32>}, {pipeline_mode = #tpu.pipeline_mode<synchronous>, transform_indices = @transform_2, window_bounds = array<i64: 8, 32>}, {pipeline_mode = #tpu.pipeline_mode<synchronous>, transform_indices = @transform_3, window_bounds = array<i64: 6, 32, 32>}, {pipeline_mode = #tpu.pipeline_mode<synchronous>, transform_indices = @transform_4, window_bounds = array<i64: 14, 32>}, {pipeline_mode = #tpu.pipeline_mode<synchronous>, transform_indices = @transform_5, window_bounds = array<i64: 32, 128>}, {pipeline_mode = #tpu.pipeline_mode<synchronous>, transform_indices = @transform_6, window_bounds = array<i64: 1, 128>}, {transform_indices = @transform_7, window_bounds = array<i64: 2, 8, 128>}]} {
    %c0 = arith.constant 0 : index
    %c0_0 = arith.constant 0 : index
    %0 = vector.load %arg2[%c0, %c0_0] : memref<16x32xf32, #tpu.memory_space<vmem>>, vector<16x32xf32>
    %c0_1 = arith.constant 0 : index
    %c0_2 = arith.constant 0 : index
    %1 = vector.load %arg3[%c0_1, %c0_2] : memref<8x32xf32, #tpu.memory_space<vmem>>, vector<8x32xf32>
    %c0_3 = arith.constant 0 : index
    %c0_4 = arith.constant 0 : index
    %c0_5 = arith.constant 0 : index
    %2 = vector.load %arg4[%c0_3, %c0_4, %c0_5] : memref<6x32x32xf32, #tpu.memory_space<vmem>>, vector<6x32x32xf32>
    %c0_6 = arith.constant 0 : index
    %c0_7 = arith.constant 0 : index
    %3 = vector.load %arg5[%c0_6, %c0_7] : memref<14x32xf32, #tpu.memory_space<vmem>>, vector<14x32xf32>
    %c0_8 = arith.constant 0 : index
    %c0_9 = arith.constant 0 : index
    %4 = vector.load %arg6[%c0_8, %c0_9] : memref<32x128xf32, #tpu.memory_space<vmem>>, vector<32x128xf32>
    %c0_10 = arith.constant 0 : index
    %c0_11 = arith.constant 0 : index
    %5 = vector.load %arg7[%c0_10, %c0_11] : memref<1x128xf32, #tpu.memory_space<vmem>>, vector<1x128xf32>
    %c0_12 = arith.constant 0 : index
    %c0_13 = arith.constant 0 : index
    %c0_14 = arith.constant 0 : index
    %6 = vector.load %arg1[%c0_12, %c0_13, %c0_14] : memref<2x8x1xi32, #tpu.memory_space<vmem>>, vector<2x8x1xi32>
    %7 = tpu.iota {dimensions = array<i32: 0>} : vector<8x8xi32>
    %8 = tpu.iota {dimensions = array<i32: 1>} : vector<8x8xi32>
    %9 = arith.cmpi sgt, %8, %7 : vector<8x8xi32>
    %10 = vector.shape_cast %9 : vector<8x8xi1> to vector<1x8x8xi1>
    %11 = tpu.iota {dimensions = array<i32: 1>} : vector<8x16xi32>
    %12 = vector.extract_strided_slice %6 {offsets = [0, 0, 0], sizes = [1, 8, 1], strides = [1, 1, 1]} : vector<2x8x1xi32> to vector<1x8x1xi32>
    %13 = vector.shape_cast %12 : vector<1x8x1xi32> to vector<8x1xi32>
    %14 = vector.broadcast %13 : vector<8x1xi32> to vector<8x16xi32>
    %15 = arith.cmpi eq, %14, %11 : vector<8x16xi32>
    %16 = arith.extui %15 : vector<8x16xi1> to vector<8x16xi32>
    %17 = arith.sitofp %16 : vector<8x16xi32> to vector<8x16xf32>
    %cst = arith.constant dense<0.000000e+00> : vector<8x32xf32>
    %18 = tpu.matmul %17, %0, %cst {dimension_numbers = #tpu.dot_dimension_numbers<[1], [0], [0], [1], [0, 0, 1, 1], [], []>, precision = #tpu.contract_precision<fp32>} : vector<8x16xf32>, vector<16x32xf32>, vector<8x32xf32> -> vector<8x32xf32>
    %19 = arith.addf %18, %1 : vector<8x32xf32>
    %20 = vector.extract_strided_slice %2 {offsets = [0, 0, 0], sizes = [1, 32, 32], strides = [1, 1, 1]} : vector<6x32x32xf32> to vector<1x32x32xf32>
    %21 = vector.shape_cast %20 : vector<1x32x32xf32> to vector<32x32xf32>
    %22 = vector.extract_strided_slice %2 {offsets = [1, 0, 0], sizes = [1, 32, 32], strides = [1, 1, 1]} : vector<6x32x32xf32> to vector<1x32x32xf32>
    %23 = vector.shape_cast %22 : vector<1x32x32xf32> to vector<32x32xf32>
    %24 = vector.extract_strided_slice %2 {offsets = [2, 0, 0], sizes = [1, 32, 32], strides = [1, 1, 1]} : vector<6x32x32xf32> to vector<1x32x32xf32>
    %25 = vector.shape_cast %24 : vector<1x32x32xf32> to vector<32x32xf32>
    %26 = vector.extract_strided_slice %3 {offsets = [0, 0], sizes = [1, 32], strides = [1, 1]} : vector<14x32xf32> to vector<1x32xf32>
    %27 = vector.extract_strided_slice %3 {offsets = [1, 0], sizes = [1, 32], strides = [1, 1]} : vector<14x32xf32> to vector<1x32xf32>
    %28 = vector.extract_strided_slice %3 {offsets = [2, 0], sizes = [1, 32], strides = [1, 1]} : vector<14x32xf32> to vector<1x32xf32>
    %29 = vector.extract_strided_slice %3 {offsets = [3, 0], sizes = [1, 32], strides = [1, 1]} : vector<14x32xf32> to vector<1x32xf32>
    %30 = vector.extract_strided_slice %3 {offsets = [4, 0], sizes = [1, 32], strides = [1, 1]} : vector<14x32xf32> to vector<1x32xf32>
    %31 = vector.extract_strided_slice %3 {offsets = [5, 0], sizes = [1, 32], strides = [1, 1]} : vector<14x32xf32> to vector<1x32xf32>
    %32 = vector.extract_strided_slice %3 {offsets = [6, 0], sizes = [1, 32], strides = [1, 1]} : vector<14x32xf32> to vector<1x32xf32>
    %cst_15 = arith.constant dense<0.000000e+00> : vector<8x32xf32>
    %33 = tpu.matmul %19, %21, %cst_15 {dimension_numbers = #tpu.dot_dimension_numbers<[1], [0], [0], [1], [0, 0, 1, 1], [], []>} : vector<8x32xf32>, vector<32x32xf32>, vector<8x32xf32> -> vector<8x32xf32>
    %34 = vector.broadcast %26 : vector<1x32xf32> to vector<8x32xf32>
    %35 = arith.addf %33, %34 : vector<8x32xf32>
    %36 = tpu.transpose %35, [1, 0] : vector<8x32xf32> -> vector<32x8xf32>
    %37 = vector.shape_cast %36 : vector<32x8xf32> to vector<4x8x8xf32>
    %cst_16 = arith.constant 0.176776692 : f32
    %38 = vector.broadcast %cst_16 : f32 to vector<4x8x8xf32>
    %39 = arith.mulf %37, %38 : vector<4x8x8xf32>
    "tpu.trace_start"() <{level = 10 : i32, message = "hdq,hdk->hqk"}> : () -> ()
    %cst_17 = arith.constant dense<0.000000e+00> : vector<4x8x8xf32>
    %40 = tpu.matmul %39, %37, %cst_17 {dimension_numbers = #tpu.dot_dimension_numbers<[1], [1], [2], [2], [0, 0, 0, 2, 1, 2], [0], [0]>} : vector<4x8x8xf32>, vector<4x8x8xf32>, vector<4x8x8xf32> -> vector<4x8x8xf32>
    %cst_18 = arith.constant 0xFF800000 : f32
    "tpu.trace_stop"() : () -> ()
    %41 = vector.shape_cast %10 : vector<1x8x8xi1> to vector<1x8x8xi1>
    %42 = vector.broadcast %41 : vector<1x8x8xi1> to vector<4x8x8xi1>
    %43 = vector.broadcast %cst_18 : f32 to vector<4x8x8xf32>
    %44 = arith.select %42, %43, %40 : vector<4x8x8xi1>, vector<4x8x8xf32>
    %cst_19 = arith.constant dense<0xFF800000> : vector<4x8xf32>
    %45 = vector.multi_reduction <maximumf>, %44, %cst_19 [2] : vector<4x8x8xf32> to vector<4x8xf32>
    %46 = vector.shape_cast %45 : vector<4x8xf32> to vector<4x8x1xf32>
    %47 = vector.broadcast %46 : vector<4x8x1xf32> to vector<4x8x8xf32>
    %48 = arith.subf %44, %47 : vector<4x8x8xf32>
    %49 = math.exp %48 : vector<4x8x8xf32>
    %cst_20 = arith.constant dense<0.000000e+00> : vector<4x8xf32>
    %50 = vector.multi_reduction <add>, %49, %cst_20 [2] : vector<4x8x8xf32> to vector<4x8xf32>
    %51 = vector.shape_cast %50 : vector<4x8xf32> to vector<4x8x1xf32>
    %52 = tpu.reciprocal %51 {approx = true} : vector<4x8x1xf32> -> vector<4x8x1xf32>
    %53 = vector.broadcast %52 : vector<4x8x1xf32> to vector<4x8x8xf32>
    %54 = arith.mulf %49, %53 : vector<4x8x8xf32>
    "tpu.trace_start"() <{level = 10 : i32, message = "hdk,hqk->hdq"}> : () -> ()
    %cst_21 = arith.constant dense<0.000000e+00> : vector<4x8x8xf32>
    %55 = tpu.matmul %37, %54, %cst_21 {dimension_numbers = #tpu.dot_dimension_numbers<[2], [2], [1], [1], [0, 0, 0, 1, 1, 1], [0], [0]>} : vector<4x8x8xf32>, vector<4x8x8xf32>, vector<4x8x8xf32> -> vector<4x8x8xf32>
    "tpu.trace_stop"() : () -> ()
    %56 = vector.shape_cast %55 : vector<4x8x8xf32> to vector<32x8xf32>
    %57 = tpu.transpose %56, [1, 0] : vector<32x8xf32> -> vector<8x32xf32>
    %58 = arith.addf %19, %57 : vector<8x32xf32>
    %cst_22 = arith.constant dense<0.000000e+00> : vector<8xf32>
    %59 = vector.multi_reduction <add>, %58, %cst_22 [1] : vector<8x32xf32> to vector<8xf32>
    %60 = vector.shape_cast %59 : vector<8xf32> to vector<8x1xf32>
    %cst_23 = arith.constant 3.200000e+01 : f32
    %61 = vector.broadcast %cst_23 : f32 to vector<8x1xf32>
    %62 = arith.divf %60, %61 : vector<8x1xf32>
    %63 = vector.broadcast %62 : vector<8x1xf32> to vector<8x32xf32>
    %64 = arith.subf %58, %63 : vector<8x32xf32>
    %65 = arith.mulf %64, %64 : vector<8x32xf32>
    %cst_24 = arith.constant dense<0.000000e+00> : vector<8xf32>
    %66 = vector.multi_reduction <add>, %65, %cst_24 [1] : vector<8x32xf32> to vector<8xf32>
    %67 = vector.shape_cast %66 : vector<8xf32> to vector<8x1xf32>
    %cst_25 = arith.constant 3.200000e+01 : f32
    %68 = vector.broadcast %cst_25 : f32 to vector<8x1xf32>
    %69 = arith.divf %67, %68 : vector<8x1xf32>
    %70 = vector.broadcast %62 : vector<8x1xf32> to vector<8x32xf32>
    %71 = arith.subf %58, %70 : vector<8x32xf32>
    %cst_26 = arith.constant 9.99999974E-6 : f32
    %72 = vector.broadcast %cst_26 : f32 to vector<8x1xf32>
    %73 = arith.addf %69, %72 : vector<8x1xf32>
    %74 = math.rsqrt %73 : vector<8x1xf32>
    %75 = vector.broadcast %74 : vector<8x1xf32> to vector<8x32xf32>
    %76 = arith.mulf %71, %75 : vector<8x32xf32>
    %77 = vector.broadcast %27 : vector<1x32xf32> to vector<8x32xf32>
    %78 = arith.mulf %76, %77 : vector<8x32xf32>
    %79 = vector.broadcast %28 : vector<1x32xf32> to vector<8x32xf32>
    %80 = arith.addf %78, %79 : vector<8x32xf32>
    %cst_27 = arith.constant dense<0.000000e+00> : vector<8x32xf32>
    %81 = tpu.matmul %80, %23, %cst_27 {dimension_numbers = #tpu.dot_dimension_numbers<[1], [0], [0], [1], [0, 0, 1, 1], [], []>} : vector<8x32xf32>, vector<32x32xf32>, vector<8x32xf32> -> vector<8x32xf32>
    %82 = vector.broadcast %29 : vector<1x32xf32> to vector<8x32xf32>
    %83 = arith.addf %81, %82 : vector<8x32xf32>
    %84 = arith.negf %83 : vector<8x32xf32>
    %85 = math.exp %84 : vector<8x32xf32>
    %cst_28 = arith.constant 1.000000e+00 : f32
    %86 = vector.broadcast %cst_28 : f32 to vector<8x32xf32>
    %87 = arith.addf %86, %85 : vector<8x32xf32>
    %88 = arith.divf %86, %87 : vector<8x32xf32>
    %89 = arith.mulf %83, %88 : vector<8x32xf32>
    %cst_29 = arith.constant dense<0.000000e+00> : vector<8x32xf32>
    %90 = tpu.matmul %89, %25, %cst_29 {dimension_numbers = #tpu.dot_dimension_numbers<[1], [0], [0], [1], [0, 0, 1, 1], [], []>} : vector<8x32xf32>, vector<32x32xf32>, vector<8x32xf32> -> vector<8x32xf32>
    %91 = vector.broadcast %30 : vector<1x32xf32> to vector<8x32xf32>
    %92 = arith.addf %90, %91 : vector<8x32xf32>
    %93 = arith.addf %80, %92 : vector<8x32xf32>
    %cst_30 = arith.constant dense<0.000000e+00> : vector<8xf32>
    %94 = vector.multi_reduction <add>, %93, %cst_30 [1] : vector<8x32xf32> to vector<8xf32>
    %95 = vector.shape_cast %94 : vector<8xf32> to vector<8x1xf32>
    %cst_31 = arith.constant 3.200000e+01 : f32
    %96 = vector.broadcast %cst_31 : f32 to vector<8x1xf32>
    %97 = arith.divf %95, %96 : vector<8x1xf32>
    %98 = vector.broadcast %97 : vector<8x1xf32> to vector<8x32xf32>
    %99 = arith.subf %93, %98 : vector<8x32xf32>
    %100 = arith.mulf %99, %99 : vector<8x32xf32>
    %cst_32 = arith.constant dense<0.000000e+00> : vector<8xf32>
    %101 = vector.multi_reduction <add>, %100, %cst_32 [1] : vector<8x32xf32> to vector<8xf32>
    %102 = vector.shape_cast %101 : vector<8xf32> to vector<8x1xf32>
    %cst_33 = arith.constant 3.200000e+01 : f32
    %103 = vector.broadcast %cst_33 : f32 to vector<8x1xf32>
    %104 = arith.divf %102, %103 : vector<8x1xf32>
    %105 = vector.broadcast %97 : vector<8x1xf32> to vector<8x32xf32>
    %106 = arith.subf %93, %105 : vector<8x32xf32>
    %cst_34 = arith.constant 9.99999974E-6 : f32
    %107 = vector.broadcast %cst_34 : f32 to vector<8x1xf32>
    %108 = arith.addf %104, %107 : vector<8x1xf32>
    %109 = math.rsqrt %108 : vector<8x1xf32>
    %110 = vector.broadcast %109 : vector<8x1xf32> to vector<8x32xf32>
    %111 = arith.mulf %106, %110 : vector<8x32xf32>
    %112 = vector.broadcast %31 : vector<1x32xf32> to vector<8x32xf32>
    %113 = arith.mulf %111, %112 : vector<8x32xf32>
    %114 = vector.broadcast %32 : vector<1x32xf32> to vector<8x32xf32>
    %115 = arith.addf %113, %114 : vector<8x32xf32>
    %116 = vector.extract_strided_slice %2 {offsets = [3, 0, 0], sizes = [1, 32, 32], strides = [1, 1, 1]} : vector<6x32x32xf32> to vector<1x32x32xf32>
    %117 = vector.shape_cast %116 : vector<1x32x32xf32> to vector<32x32xf32>
    %118 = vector.extract_strided_slice %2 {offsets = [4, 0, 0], sizes = [1, 32, 32], strides = [1, 1, 1]} : vector<6x32x32xf32> to vector<1x32x32xf32>
    %119 = vector.shape_cast %118 : vector<1x32x32xf32> to vector<32x32xf32>
    %120 = vector.extract_strided_slice %2 {offsets = [5, 0, 0], sizes = [1, 32, 32], strides = [1, 1, 1]} : vector<6x32x32xf32> to vector<1x32x32xf32>
    %121 = vector.shape_cast %120 : vector<1x32x32xf32> to vector<32x32xf32>
    %122 = vector.extract_strided_slice %3 {offsets = [7, 0], sizes = [1, 32], strides = [1, 1]} : vector<14x32xf32> to vector<1x32xf32>
    %123 = vector.extract_strided_slice %3 {offsets = [8, 0], sizes = [1, 32], strides = [1, 1]} : vector<14x32xf32> to vector<1x32xf32>
    %124 = vector.extract_strided_slice %3 {offsets = [9, 0], sizes = [1, 32], strides = [1, 1]} : vector<14x32xf32> to vector<1x32xf32>
    %125 = vector.extract_strided_slice %3 {offsets = [10, 0], sizes = [1, 32], strides = [1, 1]} : vector<14x32xf32> to vector<1x32xf32>
    %126 = vector.extract_strided_slice %3 {offsets = [11, 0], sizes = [1, 32], strides = [1, 1]} : vector<14x32xf32> to vector<1x32xf32>
    %127 = vector.extract_strided_slice %3 {offsets = [12, 0], sizes = [1, 32], strides = [1, 1]} : vector<14x32xf32> to vector<1x32xf32>
    %128 = vector.extract_strided_slice %3 {offsets = [13, 0], sizes = [1, 32], strides = [1, 1]} : vector<14x32xf32> to vector<1x32xf32>
    %cst_35 = arith.constant dense<0.000000e+00> : vector<8x32xf32>
    %129 = tpu.matmul %115, %117, %cst_35 {dimension_numbers = #tpu.dot_dimension_numbers<[1], [0], [0], [1], [0, 0, 1, 1], [], []>} : vector<8x32xf32>, vector<32x32xf32>, vector<8x32xf32> -> vector<8x32xf32>
    %130 = vector.broadcast %122 : vector<1x32xf32> to vector<8x32xf32>
    %131 = arith.addf %129, %130 : vector<8x32xf32>
    %132 = tpu.transpose %131, [1, 0] : vector<8x32xf32> -> vector<32x8xf32>
    %133 = vector.shape_cast %132 : vector<32x8xf32> to vector<4x8x8xf32>
    %cst_36 = arith.constant 0.176776692 : f32
    %134 = vector.broadcast %cst_36 : f32 to vector<4x8x8xf32>
    %135 = arith.mulf %133, %134 : vector<4x8x8xf32>
    "tpu.trace_start"() <{level = 10 : i32, message = "hdq,hdk->hqk"}> : () -> ()
    %cst_37 = arith.constant dense<0.000000e+00> : vector<4x8x8xf32>
    %136 = tpu.matmul %135, %133, %cst_37 {dimension_numbers = #tpu.dot_dimension_numbers<[1], [1], [2], [2], [0, 0, 0, 2, 1, 2], [0], [0]>} : vector<4x8x8xf32>, vector<4x8x8xf32>, vector<4x8x8xf32> -> vector<4x8x8xf32>
    %cst_38 = arith.constant 0xFF800000 : f32
    "tpu.trace_stop"() : () -> ()
    %137 = vector.shape_cast %10 : vector<1x8x8xi1> to vector<1x8x8xi1>
    %138 = vector.broadcast %137 : vector<1x8x8xi1> to vector<4x8x8xi1>
    %139 = vector.broadcast %cst_38 : f32 to vector<4x8x8xf32>
    %140 = arith.select %138, %139, %136 : vector<4x8x8xi1>, vector<4x8x8xf32>
    %cst_39 = arith.constant dense<0xFF800000> : vector<4x8xf32>
    %141 = vector.multi_reduction <maximumf>, %140, %cst_39 [2] : vector<4x8x8xf32> to vector<4x8xf32>
    %142 = vector.shape_cast %141 : vector<4x8xf32> to vector<4x8x1xf32>
    %143 = vector.broadcast %142 : vector<4x8x1xf32> to vector<4x8x8xf32>
    %144 = arith.subf %140, %143 : vector<4x8x8xf32>
    %145 = math.exp %144 : vector<4x8x8xf32>
    %cst_40 = arith.constant dense<0.000000e+00> : vector<4x8xf32>
    %146 = vector.multi_reduction <add>, %145, %cst_40 [2] : vector<4x8x8xf32> to vector<4x8xf32>
    %147 = vector.shape_cast %146 : vector<4x8xf32> to vector<4x8x1xf32>
    %148 = tpu.reciprocal %147 {approx = true} : vector<4x8x1xf32> -> vector<4x8x1xf32>
    %149 = vector.broadcast %148 : vector<4x8x1xf32> to vector<4x8x8xf32>
    %150 = arith.mulf %145, %149 : vector<4x8x8xf32>
    "tpu.trace_start"() <{level = 10 : i32, message = "hdk,hqk->hdq"}> : () -> ()
    %cst_41 = arith.constant dense<0.000000e+00> : vector<4x8x8xf32>
    %151 = tpu.matmul %133, %150, %cst_41 {dimension_numbers = #tpu.dot_dimension_numbers<[2], [2], [1], [1], [0, 0, 0, 1, 1, 1], [0], [0]>} : vector<4x8x8xf32>, vector<4x8x8xf32>, vector<4x8x8xf32> -> vector<4x8x8xf32>
    "tpu.trace_stop"() : () -> ()
    %152 = vector.shape_cast %151 : vector<4x8x8xf32> to vector<32x8xf32>
    %153 = tpu.transpose %152, [1, 0] : vector<32x8xf32> -> vector<8x32xf32>
    %154 = arith.addf %115, %153 : vector<8x32xf32>
    %cst_42 = arith.constant dense<0.000000e+00> : vector<8xf32>
    %155 = vector.multi_reduction <add>, %154, %cst_42 [1] : vector<8x32xf32> to vector<8xf32>
    %156 = vector.shape_cast %155 : vector<8xf32> to vector<8x1xf32>
    %cst_43 = arith.constant 3.200000e+01 : f32
    %157 = vector.broadcast %cst_43 : f32 to vector<8x1xf32>
    %158 = arith.divf %156, %157 : vector<8x1xf32>
    %159 = vector.broadcast %158 : vector<8x1xf32> to vector<8x32xf32>
    %160 = arith.subf %154, %159 : vector<8x32xf32>
    %161 = arith.mulf %160, %160 : vector<8x32xf32>
    %cst_44 = arith.constant dense<0.000000e+00> : vector<8xf32>
    %162 = vector.multi_reduction <add>, %161, %cst_44 [1] : vector<8x32xf32> to vector<8xf32>
    %163 = vector.shape_cast %162 : vector<8xf32> to vector<8x1xf32>
    %cst_45 = arith.constant 3.200000e+01 : f32
    %164 = vector.broadcast %cst_45 : f32 to vector<8x1xf32>
    %165 = arith.divf %163, %164 : vector<8x1xf32>
    %166 = vector.broadcast %158 : vector<8x1xf32> to vector<8x32xf32>
    %167 = arith.subf %154, %166 : vector<8x32xf32>
    %cst_46 = arith.constant 9.99999974E-6 : f32
    %168 = vector.broadcast %cst_46 : f32 to vector<8x1xf32>
    %169 = arith.addf %165, %168 : vector<8x1xf32>
    %170 = math.rsqrt %169 : vector<8x1xf32>
    %171 = vector.broadcast %170 : vector<8x1xf32> to vector<8x32xf32>
    %172 = arith.mulf %167, %171 : vector<8x32xf32>
    %173 = vector.broadcast %123 : vector<1x32xf32> to vector<8x32xf32>
    %174 = arith.mulf %172, %173 : vector<8x32xf32>
    %175 = vector.broadcast %124 : vector<1x32xf32> to vector<8x32xf32>
    %176 = arith.addf %174, %175 : vector<8x32xf32>
    %cst_47 = arith.constant dense<0.000000e+00> : vector<8x32xf32>
    %177 = tpu.matmul %176, %119, %cst_47 {dimension_numbers = #tpu.dot_dimension_numbers<[1], [0], [0], [1], [0, 0, 1, 1], [], []>} : vector<8x32xf32>, vector<32x32xf32>, vector<8x32xf32> -> vector<8x32xf32>
    %178 = vector.broadcast %125 : vector<1x32xf32> to vector<8x32xf32>
    %179 = arith.addf %177, %178 : vector<8x32xf32>
    %180 = arith.negf %179 : vector<8x32xf32>
    %181 = math.exp %180 : vector<8x32xf32>
    %cst_48 = arith.constant 1.000000e+00 : f32
    %182 = vector.broadcast %cst_48 : f32 to vector<8x32xf32>
    %183 = arith.addf %182, %181 : vector<8x32xf32>
    %184 = arith.divf %182, %183 : vector<8x32xf32>
    %185 = arith.mulf %179, %184 : vector<8x32xf32>
    %cst_49 = arith.constant dense<0.000000e+00> : vector<8x32xf32>
    %186 = tpu.matmul %185, %121, %cst_49 {dimension_numbers = #tpu.dot_dimension_numbers<[1], [0], [0], [1], [0, 0, 1, 1], [], []>} : vector<8x32xf32>, vector<32x32xf32>, vector<8x32xf32> -> vector<8x32xf32>
    %187 = vector.broadcast %126 : vector<1x32xf32> to vector<8x32xf32>
    %188 = arith.addf %186, %187 : vector<8x32xf32>
    %189 = arith.addf %176, %188 : vector<8x32xf32>
    %cst_50 = arith.constant dense<0.000000e+00> : vector<8xf32>
    %190 = vector.multi_reduction <add>, %189, %cst_50 [1] : vector<8x32xf32> to vector<8xf32>
    %191 = vector.shape_cast %190 : vector<8xf32> to vector<8x1xf32>
    %cst_51 = arith.constant 3.200000e+01 : f32
    %192 = vector.broadcast %cst_51 : f32 to vector<8x1xf32>
    %193 = arith.divf %191, %192 : vector<8x1xf32>
    %194 = vector.broadcast %193 : vector<8x1xf32> to vector<8x32xf32>
    %195 = arith.subf %189, %194 : vector<8x32xf32>
    %196 = arith.mulf %195, %195 : vector<8x32xf32>
    %cst_52 = arith.constant dense<0.000000e+00> : vector<8xf32>
    %197 = vector.multi_reduction <add>, %196, %cst_52 [1] : vector<8x32xf32> to vector<8xf32>
    %198 = vector.shape_cast %197 : vector<8xf32> to vector<8x1xf32>
    %cst_53 = arith.constant 3.200000e+01 : f32
    %199 = vector.broadcast %cst_53 : f32 to vector<8x1xf32>
    %200 = arith.divf %198, %199 : vector<8x1xf32>
    %201 = vector.broadcast %193 : vector<8x1xf32> to vector<8x32xf32>
    %202 = arith.subf %189, %201 : vector<8x32xf32>
    %cst_54 = arith.constant 9.99999974E-6 : f32
    %203 = vector.broadcast %cst_54 : f32 to vector<8x1xf32>
    %204 = arith.addf %200, %203 : vector<8x1xf32>
    %205 = math.rsqrt %204 : vector<8x1xf32>
    %206 = vector.broadcast %205 : vector<8x1xf32> to vector<8x32xf32>
    %207 = arith.mulf %202, %206 : vector<8x32xf32>
    %208 = vector.broadcast %127 : vector<1x32xf32> to vector<8x32xf32>
    %209 = arith.mulf %207, %208 : vector<8x32xf32>
    %210 = vector.broadcast %128 : vector<1x32xf32> to vector<8x32xf32>
    %211 = arith.addf %209, %210 : vector<8x32xf32>
    %cst_55 = arith.constant dense<0.000000e+00> : vector<8x128xf32>
    %212 = tpu.matmul %211, %4, %cst_55 {dimension_numbers = #tpu.dot_dimension_numbers<[1], [0], [0], [1], [0, 0, 1, 1], [], []>} : vector<8x32xf32>, vector<32x128xf32>, vector<8x128xf32> -> vector<8x128xf32>
    %213 = vector.broadcast %5 : vector<1x128xf32> to vector<8x128xf32>
    %214 = arith.addf %212, %213 : vector<8x128xf32>
    %c0_56 = arith.constant 0 : index
    %c0_57 = arith.constant 0 : index
    %c0_58 = arith.constant 0 : index
    %215 = vector.load %arg8[%c0_56, %c0_57, %c0_58] : memref<2x8x128xf32, #tpu.memory_space<vmem>>, vector<1x8x128xf32>
    %216 = vector.shape_cast %215 : vector<1x8x128xf32> to vector<8x128xf32>
    %217 = vector.shape_cast %214 : vector<8x128xf32> to vector<1x8x128xf32>
    tpu.vector_store %arg8[%c0_56, %c0_57, %c0_58], %217 {strides = array<i32>} : memref<2x8x128xf32, #tpu.memory_space<vmem>>, vector<1x8x128xf32>,
    %218 = vector.extract_strided_slice %6 {offsets = [1, 0, 0], sizes = [1, 8, 1], strides = [1, 1, 1]} : vector<2x8x1xi32> to vector<1x8x1xi32>
    %219 = vector.shape_cast %218 : vector<1x8x1xi32> to vector<8x1xi32>
    %220 = vector.broadcast %219 : vector<8x1xi32> to vector<8x16xi32>
    %221 = arith.cmpi eq, %220, %11 : vector<8x16xi32>
    %222 = arith.extui %221 : vector<8x16xi1> to vector<8x16xi32>
    %223 = arith.sitofp %222 : vector<8x16xi32> to vector<8x16xf32>
    %cst_59 = arith.constant dense<0.000000e+00> : vector<8x32xf32>
    %224 = tpu.matmul %223, %0, %cst_59 {dimension_numbers = #tpu.dot_dimension_numbers<[1], [0], [0], [1], [0, 0, 1, 1], [], []>, precision = #tpu.contract_precision<fp32>} : vector<8x16xf32>, vector<16x32xf32>, vector<8x32xf32> -> vector<8x32xf32>
    %225 = arith.addf %224, %1 : vector<8x32xf32>
    %226 = vector.extract_strided_slice %2 {offsets = [0, 0, 0], sizes = [1, 32, 32], strides = [1, 1, 1]} : vector<6x32x32xf32> to vector<1x32x32xf32>
    %227 = vector.shape_cast %226 : vector<1x32x32xf32> to vector<32x32xf32>
    %228 = vector.extract_strided_slice %2 {offsets = [1, 0, 0], sizes = [1, 32, 32], strides = [1, 1, 1]} : vector<6x32x32xf32> to vector<1x32x32xf32>
    %229 = vector.shape_cast %228 : vector<1x32x32xf32> to vector<32x32xf32>
    %230 = vector.extract_strided_slice %2 {offsets = [2, 0, 0], sizes = [1, 32, 32], strides = [1, 1, 1]} : vector<6x32x32xf32> to vector<1x32x32xf32>
    %231 = vector.shape_cast %230 : vector<1x32x32xf32> to vector<32x32xf32>
    %232 = vector.extract_strided_slice %3 {offsets = [0, 0], sizes = [1, 32], strides = [1, 1]} : vector<14x32xf32> to vector<1x32xf32>
    %233 = vector.extract_strided_slice %3 {offsets = [1, 0], sizes = [1, 32], strides = [1, 1]} : vector<14x32xf32> to vector<1x32xf32>
    %234 = vector.extract_strided_slice %3 {offsets = [2, 0], sizes = [1, 32], strides = [1, 1]} : vector<14x32xf32> to vector<1x32xf32>
    %235 = vector.extract_strided_slice %3 {offsets = [3, 0], sizes = [1, 32], strides = [1, 1]} : vector<14x32xf32> to vector<1x32xf32>
    %236 = vector.extract_strided_slice %3 {offsets = [4, 0], sizes = [1, 32], strides = [1, 1]} : vector<14x32xf32> to vector<1x32xf32>
    %237 = vector.extract_strided_slice %3 {offsets = [5, 0], sizes = [1, 32], strides = [1, 1]} : vector<14x32xf32> to vector<1x32xf32>
    %238 = vector.extract_strided_slice %3 {offsets = [6, 0], sizes = [1, 32], strides = [1, 1]} : vector<14x32xf32> to vector<1x32xf32>
    %cst_60 = arith.constant dense<0.000000e+00> : vector<8x32xf32>
    %239 = tpu.matmul %225, %227, %cst_60 {dimension_numbers = #tpu.dot_dimension_numbers<[1], [0], [0], [1], [0, 0, 1, 1], [], []>} : vector<8x32xf32>, vector<32x32xf32>, vector<8x32xf32> -> vector<8x32xf32>
    %240 = vector.broadcast %232 : vector<1x32xf32> to vector<8x32xf32>
    %241 = arith.addf %239, %240 : vector<8x32xf32>
    %242 = tpu.transpose %241, [1, 0] : vector<8x32xf32> -> vector<32x8xf32>
    %243 = vector.shape_cast %242 : vector<32x8xf32> to vector<4x8x8xf32>
    %cst_61 = arith.constant 0.176776692 : f32
    %244 = vector.broadcast %cst_61 : f32 to vector<4x8x8xf32>
    %245 = arith.mulf %243, %244 : vector<4x8x8xf32>
    "tpu.trace_start"() <{level = 10 : i32, message = "hdq,hdk->hqk"}> : () -> ()
    %cst_62 = arith.constant dense<0.000000e+00> : vector<4x8x8xf32>
    %246 = tpu.matmul %245, %243, %cst_62 {dimension_numbers = #tpu.dot_dimension_numbers<[1], [1], [2], [2], [0, 0, 0, 2, 1, 2], [0], [0]>} : vector<4x8x8xf32>, vector<4x8x8xf32>, vector<4x8x8xf32> -> vector<4x8x8xf32>
    %cst_63 = arith.constant 0xFF800000 : f32
    "tpu.trace_stop"() : () -> ()
    %247 = vector.shape_cast %10 : vector<1x8x8xi1> to vector<1x8x8xi1>
    %248 = vector.broadcast %247 : vector<1x8x8xi1> to vector<4x8x8xi1>
    %249 = vector.broadcast %cst_63 : f32 to vector<4x8x8xf32>
    %250 = arith.select %248, %249, %246 : vector<4x8x8xi1>, vector<4x8x8xf32>
    %cst_64 = arith.constant dense<0xFF800000> : vector<4x8xf32>
    %251 = vector.multi_reduction <maximumf>, %250, %cst_64 [2] : vector<4x8x8xf32> to vector<4x8xf32>
    %252 = vector.shape_cast %251 : vector<4x8xf32> to vector<4x8x1xf32>
    %253 = vector.broadcast %252 : vector<4x8x1xf32> to vector<4x8x8xf32>
    %254 = arith.subf %250, %253 : vector<4x8x8xf32>
    %255 = math.exp %254 : vector<4x8x8xf32>
    %cst_65 = arith.constant dense<0.000000e+00> : vector<4x8xf32>
    %256 = vector.multi_reduction <add>, %255, %cst_65 [2] : vector<4x8x8xf32> to vector<4x8xf32>
    %257 = vector.shape_cast %256 : vector<4x8xf32> to vector<4x8x1xf32>
    %258 = tpu.reciprocal %257 {approx = true} : vector<4x8x1xf32> -> vector<4x8x1xf32>
    %259 = vector.broadcast %258 : vector<4x8x1xf32> to vector<4x8x8xf32>
    %260 = arith.mulf %255, %259 : vector<4x8x8xf32>
    "tpu.trace_start"() <{level = 10 : i32, message = "hdk,hqk->hdq"}> : () -> ()
    %cst_66 = arith.constant dense<0.000000e+00> : vector<4x8x8xf32>
    %261 = tpu.matmul %243, %260, %cst_66 {dimension_numbers = #tpu.dot_dimension_numbers<[2], [2], [1], [1], [0, 0, 0, 1, 1, 1], [0], [0]>} : vector<4x8x8xf32>, vector<4x8x8xf32>, vector<4x8x8xf32> -> vector<4x8x8xf32>
    "tpu.trace_stop"() : () -> ()
    %262 = vector.shape_cast %261 : vector<4x8x8xf32> to vector<32x8xf32>
    %263 = tpu.transpose %262, [1, 0] : vector<32x8xf32> -> vector<8x32xf32>
    %264 = arith.addf %225, %263 : vector<8x32xf32>
    %cst_67 = arith.constant dense<0.000000e+00> : vector<8xf32>
    %265 = vector.multi_reduction <add>, %264, %cst_67 [1] : vector<8x32xf32> to vector<8xf32>
    %266 = vector.shape_cast %265 : vector<8xf32> to vector<8x1xf32>
    %cst_68 = arith.constant 3.200000e+01 : f32
    %267 = vector.broadcast %cst_68 : f32 to vector<8x1xf32>
    %268 = arith.divf %266, %267 : vector<8x1xf32>
    %269 = vector.broadcast %268 : vector<8x1xf32> to vector<8x32xf32>
    %270 = arith.subf %264, %269 : vector<8x32xf32>
    %271 = arith.mulf %270, %270 : vector<8x32xf32>
    %cst_69 = arith.constant dense<0.000000e+00> : vector<8xf32>
    %272 = vector.multi_reduction <add>, %271, %cst_69 [1] : vector<8x32xf32> to vector<8xf32>
    %273 = vector.shape_cast %272 : vector<8xf32> to vector<8x1xf32>
    %cst_70 = arith.constant 3.200000e+01 : f32
    %274 = vector.broadcast %cst_70 : f32 to vector<8x1xf32>
    %275 = arith.divf %273, %274 : vector<8x1xf32>
    %276 = vector.broadcast %268 : vector<8x1xf32> to vector<8x32xf32>
    %277 = arith.subf %264, %276 : vector<8x32xf32>
    %cst_71 = arith.constant 9.99999974E-6 : f32
    %278 = vector.broadcast %cst_71 : f32 to vector<8x1xf32>
    %279 = arith.addf %275, %278 : vector<8x1xf32>
    %280 = math.rsqrt %279 : vector<8x1xf32>
    %281 = vector.broadcast %280 : vector<8x1xf32> to vector<8x32xf32>
    %282 = arith.mulf %277, %281 : vector<8x32xf32>
    %283 = vector.broadcast %233 : vector<1x32xf32> to vector<8x32xf32>
    %284 = arith.mulf %282, %283 : vector<8x32xf32>
    %285 = vector.broadcast %234 : vector<1x32xf32> to vector<8x32xf32>
    %286 = arith.addf %284, %285 : vector<8x32xf32>
    %cst_72 = arith.constant dense<0.000000e+00> : vector<8x32xf32>
    %287 = tpu.matmul %286, %229, %cst_72 {dimension_numbers = #tpu.dot_dimension_numbers<[1], [0], [0], [1], [0, 0, 1, 1], [], []>} : vector<8x32xf32>, vector<32x32xf32>, vector<8x32xf32> -> vector<8x32xf32>
    %288 = vector.broadcast %235 : vector<1x32xf32> to vector<8x32xf32>
    %289 = arith.addf %287, %288 : vector<8x32xf32>
    %290 = arith.negf %289 : vector<8x32xf32>
    %291 = math.exp %290 : vector<8x32xf32>
    %cst_73 = arith.constant 1.000000e+00 : f32
    %292 = vector.broadcast %cst_73 : f32 to vector<8x32xf32>
    %293 = arith.addf %292, %291 : vector<8x32xf32>
    %294 = arith.divf %292, %293 : vector<8x32xf32>
    %295 = arith.mulf %289, %294 : vector<8x32xf32>
    %cst_74 = arith.constant dense<0.000000e+00> : vector<8x32xf32>
    %296 = tpu.matmul %295, %231, %cst_74 {dimension_numbers = #tpu.dot_dimension_numbers<[1], [0], [0], [1], [0, 0, 1, 1], [], []>} : vector<8x32xf32>, vector<32x32xf32>, vector<8x32xf32> -> vector<8x32xf32>
    %297 = vector.broadcast %236 : vector<1x32xf32> to vector<8x32xf32>
    %298 = arith.addf %296, %297 : vector<8x32xf32>
    %299 = arith.addf %286, %298 : vector<8x32xf32>
    %cst_75 = arith.constant dense<0.000000e+00> : vector<8xf32>
    %300 = vector.multi_reduction <add>, %299, %cst_75 [1] : vector<8x32xf32> to vector<8xf32>
    %301 = vector.shape_cast %300 : vector<8xf32> to vector<8x1xf32>
    %cst_76 = arith.constant 3.200000e+01 : f32
    %302 = vector.broadcast %cst_76 : f32 to vector<8x1xf32>
    %303 = arith.divf %301, %302 : vector<8x1xf32>
    %304 = vector.broadcast %303 : vector<8x1xf32> to vector<8x32xf32>
    %305 = arith.subf %299, %304 : vector<8x32xf32>
    %306 = arith.mulf %305, %305 : vector<8x32xf32>
    %cst_77 = arith.constant dense<0.000000e+00> : vector<8xf32>
    %307 = vector.multi_reduction <add>, %306, %cst_77 [1] : vector<8x32xf32> to vector<8xf32>
    %308 = vector.shape_cast %307 : vector<8xf32> to vector<8x1xf32>
    %cst_78 = arith.constant 3.200000e+01 : f32
    %309 = vector.broadcast %cst_78 : f32 to vector<8x1xf32>
    %310 = arith.divf %308, %309 : vector<8x1xf32>
    %311 = vector.broadcast %303 : vector<8x1xf32> to vector<8x32xf32>
    %312 = arith.subf %299, %311 : vector<8x32xf32>
    %cst_79 = arith.constant 9.99999974E-6 : f32
    %313 = vector.broadcast %cst_79 : f32 to vector<8x1xf32>
    %314 = arith.addf %310, %313 : vector<8x1xf32>
    %315 = math.rsqrt %314 : vector<8x1xf32>
    %316 = vector.broadcast %315 : vector<8x1xf32> to vector<8x32xf32>
    %317 = arith.mulf %312, %316 : vector<8x32xf32>
    %318 = vector.broadcast %237 : vector<1x32xf32> to vector<8x32xf32>
    %319 = arith.mulf %317, %318 : vector<8x32xf32>
    %320 = vector.broadcast %238 : vector<1x32xf32> to vector<8x32xf32>
    %321 = arith.addf %319, %320 : vector<8x32xf32>
    %322 = vector.extract_strided_slice %2 {offsets = [3, 0, 0], sizes = [1, 32, 32], strides = [1, 1, 1]} : vector<6x32x32xf32> to vector<1x32x32xf32>
    %323 = vector.shape_cast %322 : vector<1x32x32xf32> to vector<32x32xf32>
    %324 = vector.extract_strided_slice %2 {offsets = [4, 0, 0], sizes = [1, 32, 32], strides = [1, 1, 1]} : vector<6x32x32xf32> to vector<1x32x32xf32>
    %325 = vector.shape_cast %324 : vector<1x32x32xf32> to vector<32x32xf32>
    %326 = vector.extract_strided_slice %2 {offsets = [5, 0, 0], sizes = [1, 32, 32], strides = [1, 1, 1]} : vector<6x32x32xf32> to vector<1x32x32xf32>
    %327 = vector.shape_cast %326 : vector<1x32x32xf32> to vector<32x32xf32>
    %328 = vector.extract_strided_slice %3 {offsets = [7, 0], sizes = [1, 32], strides = [1, 1]} : vector<14x32xf32> to vector<1x32xf32>
    %329 = vector.extract_strided_slice %3 {offsets = [8, 0], sizes = [1, 32], strides = [1, 1]} : vector<14x32xf32> to vector<1x32xf32>
    %330 = vector.extract_strided_slice %3 {offsets = [9, 0], sizes = [1, 32], strides = [1, 1]} : vector<14x32xf32> to vector<1x32xf32>
    %331 = vector.extract_strided_slice %3 {offsets = [10, 0], sizes = [1, 32], strides = [1, 1]} : vector<14x32xf32> to vector<1x32xf32>
    %332 = vector.extract_strided_slice %3 {offsets = [11, 0], sizes = [1, 32], strides = [1, 1]} : vector<14x32xf32> to vector<1x32xf32>
    %333 = vector.extract_strided_slice %3 {offsets = [12, 0], sizes = [1, 32], strides = [1, 1]} : vector<14x32xf32> to vector<1x32xf32>
    %334 = vector.extract_strided_slice %3 {offsets = [13, 0], sizes = [1, 32], strides = [1, 1]} : vector<14x32xf32> to vector<1x32xf32>
    %cst_80 = arith.constant dense<0.000000e+00> : vector<8x32xf32>
    %335 = tpu.matmul %321, %323, %cst_80 {dimension_numbers = #tpu.dot_dimension_numbers<[1], [0], [0], [1], [0, 0, 1, 1], [], []>} : vector<8x32xf32>, vector<32x32xf32>, vector<8x32xf32> -> vector<8x32xf32>
    %336 = vector.broadcast %328 : vector<1x32xf32> to vector<8x32xf32>
    %337 = arith.addf %335, %336 : vector<8x32xf32>
    %338 = tpu.transpose %337, [1, 0] : vector<8x32xf32> -> vector<32x8xf32>
    %339 = vector.shape_cast %338 : vector<32x8xf32> to vector<4x8x8xf32>
    %cst_81 = arith.constant 0.176776692 : f32
    %340 = vector.broadcast %cst_81 : f32 to vector<4x8x8xf32>
    %341 = arith.mulf %339, %340 : vector<4x8x8xf32>
    "tpu.trace_start"() <{level = 10 : i32, message = "hdq,hdk->hqk"}> : () -> ()
    %cst_82 = arith.constant dense<0.000000e+00> : vector<4x8x8xf32>
    %342 = tpu.matmul %341, %339, %cst_82 {dimension_numbers = #tpu.dot_dimension_numbers<[1], [1], [2], [2], [0, 0, 0, 2, 1, 2], [0], [0]>} : vector<4x8x8xf32>, vector<4x8x8xf32>, vector<4x8x8xf32> -> vector<4x8x8xf32>
    %cst_83 = arith.constant 0xFF800000 : f32
    "tpu.trace_stop"() : () -> ()
    %343 = vector.shape_cast %10 : vector<1x8x8xi1> to vector<1x8x8xi1>
    %344 = vector.broadcast %343 : vector<1x8x8xi1> to vector<4x8x8xi1>
    %345 = vector.broadcast %cst_83 : f32 to vector<4x8x8xf32>
    %346 = arith.select %344, %345, %342 : vector<4x8x8xi1>, vector<4x8x8xf32>
    %cst_84 = arith.constant dense<0xFF800000> : vector<4x8xf32>
    %347 = vector.multi_reduction <maximumf>, %346, %cst_84 [2] : vector<4x8x8xf32> to vector<4x8xf32>
    %348 = vector.shape_cast %347 : vector<4x8xf32> to vector<4x8x1xf32>
    %349 = vector.broadcast %348 : vector<4x8x1xf32> to vector<4x8x8xf32>
    %350 = arith.subf %346, %349 : vector<4x8x8xf32>
    %351 = math.exp %350 : vector<4x8x8xf32>
    %cst_85 = arith.constant dense<0.000000e+00> : vector<4x8xf32>
    %352 = vector.multi_reduction <add>, %351, %cst_85 [2] : vector<4x8x8xf32> to vector<4x8xf32>
    %353 = vector.shape_cast %352 : vector<4x8xf32> to vector<4x8x1xf32>
    %354 = tpu.reciprocal %353 {approx = true} : vector<4x8x1xf32> -> vector<4x8x1xf32>
    %355 = vector.broadcast %354 : vector<4x8x1xf32> to vector<4x8x8xf32>
    %356 = arith.mulf %351, %355 : vector<4x8x8xf32>
    "tpu.trace_start"() <{level = 10 : i32, message = "hdk,hqk->hdq"}> : () -> ()
    %cst_86 = arith.constant dense<0.000000e+00> : vector<4x8x8xf32>
    %357 = tpu.matmul %339, %356, %cst_86 {dimension_numbers = #tpu.dot_dimension_numbers<[2], [2], [1], [1], [0, 0, 0, 1, 1, 1], [0], [0]>} : vector<4x8x8xf32>, vector<4x8x8xf32>, vector<4x8x8xf32> -> vector<4x8x8xf32>
    "tpu.trace_stop"() : () -> ()
    %358 = vector.shape_cast %357 : vector<4x8x8xf32> to vector<32x8xf32>
    %359 = tpu.transpose %358, [1, 0] : vector<32x8xf32> -> vector<8x32xf32>
    %360 = arith.addf %321, %359 : vector<8x32xf32>
    %cst_87 = arith.constant dense<0.000000e+00> : vector<8xf32>
    %361 = vector.multi_reduction <add>, %360, %cst_87 [1] : vector<8x32xf32> to vector<8xf32>
    %362 = vector.shape_cast %361 : vector<8xf32> to vector<8x1xf32>
    %cst_88 = arith.constant 3.200000e+01 : f32
    %363 = vector.broadcast %cst_88 : f32 to vector<8x1xf32>
    %364 = arith.divf %362, %363 : vector<8x1xf32>
    %365 = vector.broadcast %364 : vector<8x1xf32> to vector<8x32xf32>
    %366 = arith.subf %360, %365 : vector<8x32xf32>
    %367 = arith.mulf %366, %366 : vector<8x32xf32>
    %cst_89 = arith.constant dense<0.000000e+00> : vector<8xf32>
    %368 = vector.multi_reduction <add>, %367, %cst_89 [1] : vector<8x32xf32> to vector<8xf32>
    %369 = vector.shape_cast %368 : vector<8xf32> to vector<8x1xf32>
    %cst_90 = arith.constant 3.200000e+01 : f32
    %370 = vector.broadcast %cst_90 : f32 to vector<8x1xf32>
    %371 = arith.divf %369, %370 : vector<8x1xf32>
    %372 = vector.broadcast %364 : vector<8x1xf32> to vector<8x32xf32>
    %373 = arith.subf %360, %372 : vector<8x32xf32>
    %cst_91 = arith.constant 9.99999974E-6 : f32
    %374 = vector.broadcast %cst_91 : f32 to vector<8x1xf32>
    %375 = arith.addf %371, %374 : vector<8x1xf32>
    %376 = math.rsqrt %375 : vector<8x1xf32>
    %377 = vector.broadcast %376 : vector<8x1xf32> to vector<8x32xf32>
    %378 = arith.mulf %373, %377 : vector<8x32xf32>
    %379 = vector.broadcast %329 : vector<1x32xf32> to vector<8x32xf32>
    %380 = arith.mulf %378, %379 : vector<8x32xf32>
    %381 = vector.broadcast %330 : vector<1x32xf32> to vector<8x32xf32>
    %382 = arith.addf %380, %381 : vector<8x32xf32>
    %cst_92 = arith.constant dense<0.000000e+00> : vector<8x32xf32>
    %383 = tpu.matmul %382, %325, %cst_92 {dimension_numbers = #tpu.dot_dimension_numbers<[1], [0], [0], [1], [0, 0, 1, 1], [], []>} : vector<8x32xf32>, vector<32x32xf32>, vector<8x32xf32> -> vector<8x32xf32>
    %384 = vector.broadcast %331 : vector<1x32xf32> to vector<8x32xf32>
    %385 = arith.addf %383, %384 : vector<8x32xf32>
    %386 = arith.negf %385 : vector<8x32xf32>
    %387 = math.exp %386 : vector<8x32xf32>
    %cst_93 = arith.constant 1.000000e+00 : f32
    %388 = vector.broadcast %cst_93 : f32 to vector<8x32xf32>
    %389 = arith.addf %388, %387 : vector<8x32xf32>
    %390 = arith.divf %388, %389 : vector<8x32xf32>
    %391 = arith.mulf %385, %390 : vector<8x32xf32>
    %cst_94 = arith.constant dense<0.000000e+00> : vector<8x32xf32>
    %392 = tpu.matmul %391, %327, %cst_94 {dimension_numbers = #tpu.dot_dimension_numbers<[1], [0], [0], [1], [0, 0, 1, 1], [], []>} : vector<8x32xf32>, vector<32x32xf32>, vector<8x32xf32> -> vector<8x32xf32>
    %393 = vector.broadcast %332 : vector<1x32xf32> to vector<8x32xf32>
    %394 = arith.addf %392, %393 : vector<8x32xf32>
    %395 = arith.addf %382, %394 : vector<8x32xf32>
    %cst_95 = arith.constant dense<0.000000e+00> : vector<8xf32>
    %396 = vector.multi_reduction <add>, %395, %cst_95 [1] : vector<8x32xf32> to vector<8xf32>
    %397 = vector.shape_cast %396 : vector<8xf32> to vector<8x1xf32>
    %cst_96 = arith.constant 3.200000e+01 : f32
    %398 = vector.broadcast %cst_96 : f32 to vector<8x1xf32>
    %399 = arith.divf %397, %398 : vector<8x1xf32>
    %400 = vector.broadcast %399 : vector<8x1xf32> to vector<8x32xf32>
    %401 = arith.subf %395, %400 : vector<8x32xf32>
    %402 = arith.mulf %401, %401 : vector<8x32xf32>
    %cst_97 = arith.constant dense<0.000000e+00> : vector<8xf32>
    %403 = vector.multi_reduction <add>, %402, %cst_97 [1] : vector<8x32xf32> to vector<8xf32>
    %404 = vector.shape_cast %403 : vector<8xf32> to vector<8x1xf32>
    %cst_98 = arith.constant 3.200000e+01 : f32
    %405 = vector.broadcast %cst_98 : f32 to vector<8x1xf32>
    %406 = arith.divf %404, %405 : vector<8x1xf32>
    %407 = vector.broadcast %399 : vector<8x1xf32> to vector<8x32xf32>
    %408 = arith.subf %395, %407 : vector<8x32xf32>
    %cst_99 = arith.constant 9.99999974E-6 : f32
    %409 = vector.broadcast %cst_99 : f32 to vector<8x1xf32>
    %410 = arith.addf %406, %409 : vector<8x1xf32>
    %411 = math.rsqrt %410 : vector<8x1xf32>
    %412 = vector.broadcast %411 : vector<8x1xf32> to vector<8x32xf32>
    %413 = arith.mulf %408, %412 : vector<8x32xf32>
    %414 = vector.broadcast %333 : vector<1x32xf32> to vector<8x32xf32>
    %415 = arith.mulf %413, %414 : vector<8x32xf32>
    %416 = vector.broadcast %334 : vector<1x32xf32> to vector<8x32xf32>
    %417 = arith.addf %415, %416 : vector<8x32xf32>
    %cst_100 = arith.constant dense<0.000000e+00> : vector<8x128xf32>
    %418 = tpu.matmul %417, %4, %cst_100 {dimension_numbers = #tpu.dot_dimension_numbers<[1], [0], [0], [1], [0, 0, 1, 1], [], []>} : vector<8x32xf32>, vector<32x128xf32>, vector<8x128xf32> -> vector<8x128xf32>
    %419 = vector.broadcast %5 : vector<1x128xf32> to vector<8x128xf32>
    %420 = arith.addf %418, %419 : vector<8x128xf32>
    %c1 = arith.constant 1 : index
    %c0_101 = arith.constant 0 : index
    %c0_102 = arith.constant 0 : index
    %421 = vector.load %arg8[%c1, %c0_101, %c0_102] : memref<2x8x128xf32, #tpu.memory_space<vmem>>, vector<1x8x128xf32>
    %422 = vector.shape_cast %421 : vector<1x8x128xf32> to vector<8x128xf32>
    %423 = vector.shape_cast %420 : vector<8x128xf32> to vector<1x8x128xf32>
    tpu.vector_store %arg8[%c1, %c0_101, %c0_102], %423 {strides = array<i32>} : memref<2x8x128xf32, #tpu.memory_space<vmem>>, vector<1x8x128xf32>,
    return
  }
  func.func @transform_0(%arg0: i32) -> (i32, i32, i32) {
    %c0_i32 = arith.constant 0 : i32
    %c0_i32_0 = arith.constant 0 : i32
    %c0_i32_1 = arith.constant 0 : i32
    return %arg0, %c0_i32, %c0_i32_0 : i32, i32, i32
  }
  func.func @transform_1(%arg0: i32) -> (i32, i32) {
    %c0_i32 = arith.constant 0 : i32
    %c0_i32_0 = arith.constant 0 : i32
    %c0_i32_1 = arith.constant 0 : i32
    return %c0_i32, %c0_i32_0 : i32, i32
  }
  func.func @transform_2(%arg0: i32) -> (i32, i32) {
    %c0_i32 = arith.constant 0 : i32
    %c0_i32_0 = arith.constant 0 : i32
    %c0_i32_1 = arith.constant 0 : i32
    return %c0_i32, %c0_i32_0 : i32, i32
  }
  func.func @transform_3(%arg0: i32) -> (i32, i32, i32) {
    %c0_i32 = arith.constant 0 : i32
    %c0_i32_0 = arith.constant 0 : i32
    %c0_i32_1 = arith.constant 0 : i32
    %c0_i32_2 = arith.constant 0 : i32
    return %c0_i32, %c0_i32_0, %c0_i32_1 : i32, i32, i32
  }
  func.func @transform_4(%arg0: i32) -> (i32, i32) {
    %c0_i32 = arith.constant 0 : i32
    %c0_i32_0 = arith.constant 0 : i32
    %c0_i32_1 = arith.constant 0 : i32
    return %c0_i32, %c0_i32_0 : i32, i32
  }
  func.func @transform_5(%arg0: i32) -> (i32, i32) {
    %c0_i32 = arith.constant 0 : i32
    %c0_i32_0 = arith.constant 0 : i32
    %c0_i32_1 = arith.constant 0 : i32
    return %c0_i32, %c0_i32_0 : i32, i32
  }
  func.func @transform_6(%arg0: i32) -> (i32, i32) {
    %c0_i32 = arith.constant 0 : i32
    %c0_i32_0 = arith.constant 0 : i32
    %c0_i32_1 = arith.constant 0 : i32
    return %c0_i32, %c0_i32_0 : i32, i32
  }
  func.func @transform_7(%arg0: i32) -> (i32, i32, i32) {
    %c0_i32 = arith.constant 0 : i32
    %c0_i32_0 = arith.constant 0 : i32
    %c0_i32_1 = arith.constant 0 : i32
    return %arg0, %c0_i32, %c0_i32_0 : i32, i32, i32
  }
}

</mosaic_0001>

<bundles_post_ra>
// kernel: tpu_custom_call.1
= control target key start
LH: loop header
LB: loop body
LE: loop exit
PB: predicated region body
PF: predicated region fallthrough
CT: control target
= control target key end

     0   :  { %12 = vsyncpa [#allocation3], 0  ;;  %s7491_s0 = inlined_call_operand.vmem [shape: s32[2,8,1], index: 0, kind: input, shape index: {}]   ;;  %s7492_s1 = inlined_call_operand.hbm [shape: f32[16,32], index: 1, kind: input, shape index: {}]   ;;  %s7493_s2 = inlined_call_operand.hbm [shape: f32[8,32], index: 2, kind: input, shape index: {}]   ;;  %s7494_s3 = inlined_call_operand.hbm [shape: f32[6,32,32], index: 3, kind: input, shape index: {}]   ;;  %s7495_s4 = inlined_call_operand.hbm [shape: f32[14,32], index: 4, kind: input, shape index: {}]   ;;  %s7496_s5 = inlined_call_operand.vmem [shape: f32[32,128], index: 5, kind: input, shape index: {}]   ;;  %s7497_s6 = inlined_call_operand.vmem [shape: f32[1,128], index: 6, kind: input, shape index: {}]   ;;  %s7498_s7 = inlined_call_operand.hbm [shape: f32[2,8,128], index: 7, kind: output, shape index: {}]  }
   0x1   :  { %13 = vsyncpa [#allocation6], 0 }
   0x2   :  { %14 = vsyncpa [#allocation9], 0 }
   0x3   :  { %15 = vsyncpa [#allocation4], 0  ;;  %s6695_s24 = smov [#allocation5]   ;;  %s6696_s26 = smov [#allocation2]  }
   0x4   :  { %s36_s25 = sshll.u32 %s6695_s24, 4  ;;  %s23_s27 = sshll.u32 %s6696_s26, 4  ;;  %s37_s25 = int_to_ptr.vmem [resolvable:$true] %s36_s25  ;;  %s6746_s27 = int_to_ptr.vmem [resolvable:$true] %s23_s27 }
   0x5   :  { %s6577_s30 = scalar_lea.hbm %s7493_s2, 128 }
   0x6   :  { %p6578_p0 = scmp.ne.s32.totalorder %s7493_s2, %s6577_s30  ;;  %p6581_p1 = scmp.lt.u32.totalorder %s6577_s30, %s7493_s2 }
   0x8   :  { %p6583_p2 = pnand %p6581_p1, %p6578_p0 }
   0xa   :  { %6586 = shalt.err (!%p6583_p2)
}
   0xb   :  { %s6587_s12 = scalar_lea.vmem %s37_s25, 128  ;;  %p6592_p4 = scmp.lt.s32.totalorder %s37_s25, %s37_s25 }
   0xc   :  { %p6588_p3 = scmp.ne.s32.totalorder %s37_s25, %s6587_s12  ;;  %p6593_p5 = scmp.lt.s32.totalorder %s6587_s12, %s6587_s12 }
   0xe   :  { %p6594_p6 = por %p6593_p5, %p6592_p4 }
  0x10   :  { %p6595_p7 = pnand %p6594_p6, %p6588_p3 }
  0x12   :  { %6598 = shalt.err (!%p6595_p7)
}
  0x13   :  { %39 = dma.hbm_to_vmem [thread:$0]  %s7493_s2, 128, %s37_s25, [#allocation6]  }
  0x14   :  { %s6599_s17 = scalar_lea.hbm %s7492_s1, 256 }
  0x15   :  { %p6600_p8 = scmp.ne.s32.totalorder %s7492_s1, %s6599_s17  ;;  %p6603_p9 = scmp.lt.u32.totalorder %s6599_s17, %s7492_s1 }
  0x17   :  { %p6605_p10 = pnand %p6603_p9, %p6600_p8 }
  0x19   :  { %6608 = shalt.err (!%p6605_p10)
}
  0x1a   :  { %s6609_s22 = scalar_lea.vmem %s6746_s27, 256  ;;  %p6614_p12 = scmp.lt.s32.totalorder %s6746_s27, %s6746_s27 }
  0x1b   :  { %p6610_p11 = scmp.ne.s32.totalorder %s6746_s27, %s6609_s22  ;;  %p6615_p13 = scmp.lt.s32.totalorder %s6609_s22, %s6609_s22 }
  0x1d   :  { %p6616_p0 = por %p6615_p13, %p6614_p12 }
  0x1f   :  { %p6617_p1 = pnand %p6616_p0, %p6610_p11 }
  0x21   :  { %6620 = shalt.err (!%p6617_p1)
}
  0x22   :  { %s6697_s2 = smov 128   ;;  %s6698_s23 = smov 8  }
  0x23   :  { %29 = dma.hbm_to_vmem [thread:$0]  %s7492_s1, 256, %s6746_s27, [#allocation3], %s6697_s2, %s6697_s2, %s6698_s23  }
  0x24   :  { %s6699_s26 = smov [#allocation7]   ;;  %s6700_s29 = smov [#allocation8]  }
  0x25   :  { %s45_s28 = sshll.u32 %s6699_s26, 4  ;;  %s57_s30 = sshll.u32 %s6700_s29, 4  ;;  %s46_s28 = int_to_ptr.vmem [resolvable:$true] %s45_s28  ;;  %s6780_s30 = int_to_ptr.vmem [resolvable:$true] %s57_s30 }
  0x26   :  { %s6621_s10 = scalar_lea.hbm %s7494_s3, 3072 }
  0x27   :  { %p6622_p2 = scmp.ne.s32.totalorder %s7494_s3, %s6621_s10  ;;  %p6625_p3 = scmp.lt.u32.totalorder %s6621_s10, %s7494_s3 }
  0x29   :  { %p6627_p4 = pnand %p6625_p3, %p6622_p2 }
  0x2b   :  { %6630 = shalt.err (!%p6627_p4)
}
  0x2c   :  { %s6631_s1 = scalar_lea.vmem %s46_s28, 3072  ;;  %p6636_p6 = scmp.lt.s32.totalorder %s46_s28, %s46_s28 }
  0x2d   :  { %p6632_p5 = scmp.ne.s32.totalorder %s46_s28, %s6631_s1  ;;  %p6637_p7 = scmp.lt.s32.totalorder %s6631_s1, %s6631_s1 }
  0x2f   :  { %p6638_p8 = por %p6637_p7, %p6636_p6 }
  0x31   :  { %p6639_p9 = pnand %p6638_p8, %p6632_p5 }
  0x33   :  { %6642 = shalt.err (!%p6639_p9)
}
  0x34   :  { %51 = dma.hbm_to_vmem [thread:$0]  %s7494_s3, 3072, %s46_s28, [#allocation6], %s6697_s2, %s6697_s2, %s6698_s23  }
  0x35   :  { %s6643_s18 = scalar_lea.hbm %s7495_s4, 256 }
  0x36   :  { %p6644_p10 = scmp.ne.s32.totalorder %s7495_s4, %s6643_s18  ;;  %p6647_p11 = scmp.lt.u32.totalorder %s6643_s18, %s7495_s4 }
  0x38   :  { %p6649_p12 = pnand %p6647_p11, %p6644_p10 }
  0x3a   :  { %6652 = shalt.err (!%p6649_p12)
}
  0x3b   :  { %s6653_s24 = scalar_lea.vmem %s6780_s30, 256  ;;  %p6658_p0 = scmp.lt.s32.totalorder %s6780_s30, %s6780_s30 }
  0x3c   :  { %p6654_p13 = scmp.ne.s32.totalorder %s6780_s30, %s6653_s24  ;;  %p6659_p1 = scmp.lt.s32.totalorder %s6653_s24, %s6653_s24 }
  0x3e   :  { %p6660_p2 = por %p6659_p1, %p6658_p0 }
  0x40   :  { %p6661_p3 = pnand %p6660_p2, %p6654_p13 }
  0x42   :  { %6664 = shalt.err (!%p6661_p3)
}
  0x43   :  { %63 = dma.hbm_to_vmem [thread:$0]  %s7495_s4, 256, %s6780_s30, [#allocation9], %s6697_s2, %s6697_s2, %s6698_s23  }
  0x44   :  { %6687 = dma.done.wait [#allocation3], 256  }
  0x45   :  { %6688 = vsyncadd [#allocation3], 4294967040 }
  0x46   :  { %6689 = dma.done.wait [#allocation6], 3200  }
  0x47   :  { %6690 = vsyncadd [#allocation6], 4294964096 }
  0x48   :  { %6691 = dma.done.wait [#allocation9], 256  }
  0x49   :  { %6692 = vsyncadd [#allocation9], 4294967040  ;;  %v6701_v0 = vmov 0   ;;  %v6702_v1 = vmov 0.0|0.0   ;;  %v114_v2 = vld [vmem:[%s7491_s0] sm:$0xff]  ;;  %v81_v4 = vld [vmem:[#allocation2 + $0x8] sm:$0xff]  ;;  %v116_v20 = vlaneseq }
  0x4a   :  { %6480 = vset.pattern.permute.xlu0 %v6701_v0  ;;  %6331 = vmatprep.subr.bf16.mxu0 %v6702_v1  ;;  %v80_v3 = vld [vmem:[#allocation2] sm:$0xff]  ;;  %v135_v6 = vand.u32 4294901760, %v81_v4  ;;  %vm6703_vm0 = vmmov 0   ;;  %v6704_v7 = vmov 0.0   ;;  %vm127_vm1 = vcmask 130048   ;;  %v83_v29 = vld [vmem:[#allocation7] sm:$0xff] }
  0x4b   :  { %6328 = vmatprep.subr.bf16.mxu1 %v6702_v1  ;;  %122 = vperm.xlu0 %6480, %v114_v2   ;;  %v132_v5 = vand.u32 4294901760, %v80_v3  ;;  %v6838_v21 = vand.u32 127, %v116_v20  ;;  %v84_v30 = vld [vmem:[#allocation7 + $0x8] sm:$0xff]  ;;  %v85_v32 = vld [vmem:[#allocation7 + $0x10] sm:$0xff]  ;;  %v86_v33 = vld [vmem:[#allocation7 + $0x18] sm:$0xff]  ;;  %vm594_vm3 = vcmask 261120  }
  0x4c   :  { %5941 = vmatprep.mubr.msk.f32.mxu0 %vm6703_vm0, %v6704_v7  ;;  %5934 = vmatprep.mubr.msk.f32.mxu1 %vm6703_vm0, %v6704_v7  ;;  %v217_v9 = vsub.f32 %v81_v4, %v135_v6  ;;  %v6866_v31 = vpack.c.bf16 %v84_v30, %v83_v29  ;;  %v6870_v34 = vpack.c.bf16 %v86_v33, %v85_v32  ;;  %v6874_v37 = vld [vmem:[#allocation5] sm:$0xff]  ;;  %v6883_v42 = vshrl.u32 %v116_v20, 7  ;;  %v6886_v44 = vld [vmem:[#allocation8] sm:$0xff] }
  0x4d   :  { %v210_v8 = vsub.f32 %v80_v3, %v132_v5  ;;  %v6826_v10 = vpack.c.bf16 %v135_v6, %v132_v5  ;;  %vm736_vm4 = vcmask 64512  }
  0x4e   :  { %v218_v12 = vand.u32 4294901760, %v217_v9  ;;  %v592_v43 = vsub.s32 0, %v6883_v42  ;;  %vm6928_vm5 = vcmp.gt.s32.totalorder %v6838_v21, %v6883_v42 }
  0x4f   :  { %v211_v11 = vand.u32 4294901760, %v210_v8  ;;  %v6828_v13 = vpack.c.bf16 %v217_v9, %v210_v8  ;;  %6330 = vmatpush3.bf16.msra.mxu1 %v6826_v10 }
  0x50   :  { %v219_v15 = vsub.f32 %v217_v9, %v218_v12  ;;  %6346 = vmatprep.subr.bf16.mxu1 %v6702_v1  ;;  %v6891_v45 = vrot.slane %v6886_v44, %v592_v43 }
  0x51   :  { %v212_v14 = vsub.f32 %v210_v8, %v211_v11  ;;  %v6836_v19 = vpack.c.bf16 %v218_v12, %v211_v11 }
  0x52   :  { %v220_v17 = vand.u32 4294901760, %v219_v15 }
  0x53   :  { %v213_v16 = vand.u32 4294901760, %v212_v14 }
  0x55   :  { %v6832_v18 = vpack.c.bf16 %v220_v17, %v213_v16 }
  0x57   :  { %6333 = vmatpush3.bf16.msra.mxu0 %v6832_v18 }
  0x58   :  { %6334 = vmatprep.subr.bf16.mxu0 %v6702_v1 }
  0xca   :  { %v123_v22 = vpop.permute.xlu0 %122 }
  0xcb   :  { %vm124_vm2 = vcmp.eq.s32.totalorder %v123_v22, %v6838_v21 }
  0xcc   :  { %v5685_v23 = vsel %vm124_vm2, 1.0, %v6704_v7 }
  0xcd   :  { %v129_v24 = vsel %vm127_vm1, %v5685_v23, 0  ;;  %5942 = vmatmul.mubr.msk.f32.vlgmr.msra.gmra.mrb[0].mxu0 %vm127_vm1, %v5685_v23 }
  0xce   :  { %v199_v25 = vsub.f32 %v129_v24, %v129_v24  ;;  %6336 = vmatpush3.bf16.msra.mxu0 %v6828_v13  ;;  %5948 = vmatprep.mubr.msk.f32.mxu0 %vm6703_vm0, %v6704_v7 }
  0xcf   :  { %6337 = vmatprep.subr.bf16.mxu0 %v6702_v1 }
  0xd0   :  { %v200_v26 = vand.u32 4294901760, %v199_v25 }
  0xd2   :  { %v201_v27 = vsub.f32 %v199_v25, %v200_v26 }
  0xd4   :  { %v202_v28 = vand.u32 4294901760, %v201_v27 }
  0xd5   :  { %5949 = vmatmul.mubr.f32.vlgmr.msra.gmra.mrb[0].mxu0 %v199_v25 }
  0xd6   :  { %5935 = vmatmul.mubr.f32.vlgmr.msra.gmra.mrb[0].mxu1 %v202_v28  ;;  %6339 = vmatpush3.bf16.msra.mxu0 %v6826_v10 }
  0xd7   :  { %5955 = vmatprep.mubr.msk.f32.mxu0 %vm6703_vm0, %v6704_v7  ;;  %6340 = vmatprep.subr.bf16.mxu0 %v6702_v1 }
  0xd8   :  { %5980 = vmatprep.mubr.msk.f32.mxu1 %vm6703_vm0, %v6704_v7  ;;  %6348 = vmatpush3.bf16.msra.mxu1 %v6866_v31 }
  0xd9   :  { %6349 = vmatprep.subr.bf16.mxu1 %v6702_v1 }
  0xdc   :  { %6351 = vmatpush3.bf16.msra.mxu1 %v6870_v34 }
  0xdd   :  { %5956 = vmatmul.mubr.f32.vlgmr.msra.gmra.mrb[0].mxu0 %v200_v26  ;;  %5983 = vmatprep.subr.mxu1 %v6704_v7 }
  0xde   :  { %6342 = vmatpush3.bf16.msra.mxu0 %v6836_v19  ;;  %5962 = vmatprep.mubr.msk.f32.mxu0 %vm6703_vm0, %v6704_v7 }
  0xdf   :  { %6343 = vmatprep.subr.bf16.mxu0 %v6702_v1 }
  0xe5   :  { %5963 = vmatmul.mubr.msk.f32.vlgmr.msra.gmra.mrb[0].mxu0 %vm127_vm1, %v5685_v23 }
  0xe6   :  { %6345 = vmatpush3.bf16.msra.mxu0 %v6826_v10  ;;  %5969 = vmatprep.mubr.msk.f32.mxu0 %vm6703_vm0, %v6704_v7 }
  0xe7   :  { %6003 = vmatprep.subr.mxu0 %v6704_v7 }
  0xed   :  { %5970 = vmatmul.mubr.msk.f32.vlgmr.msra.gmra.mrb[0].mxu0 %vm127_vm1, %v5685_v23 }
  0xee   :  { %6005 = vmatprep.mubr.msk.f32.mxu0 %vm6703_vm0, %v6704_v7 }
 0x1a9   :  { %v204_v35 = vpop.f32.mrb[0].mxu1 }
 0x1aa   :  { %v5936_v36 = vpop.f32.mrb[1].mxu1  ;;  %v205_v38 = vadd.f32 %v204_v35, %v6874_v37 }
 0x1c0   :  { %v586_v39 = vpop.f32.mrb[0].mxu0 }
 0x1c1   :  { %v6877_v40 = vadd.f32 %v586_v39, %v205_v38  ;;  %v5971_v41 = vpop.f32.mrb[1].mxu0 }
 0x1c3   :  { %5981 = vmatmul.mubr.msk.f32.vlgmr.msra.gmra.mrb[2].mxu1 %vm594_vm3, %v6877_v40 }
 0x1c4   :  { %5985 = vmatprep.mubr.msk.f32.mxu1 %vm6703_vm0, %v6704_v7 }
 0x296   :  { %v664_v46 = vpop.f32.mrb[2].mxu1 }
 0x297   :  { %v665_v47 = vadd.f32 %v664_v46, %v6891_v45  ;;  %v5982_v48 = vpop.f32.mrb[3].mxu1 }
 0x299   :  { %668 = vxpose.xlu0.b32.start.end [1/1] (short) (narrow) %v665_v47, 32 }
 0x319   :  { %v6894_v49 = vpop.trf.xlu0 }
 0x31a   :  { %5984 = vmatpush3.msra.mxu1 %v6894_v49  ;;  %v700_v50 = vmul.f32 0.17677669, %v6894_v49 }
 0x31b   :  { %5988 = vmatprep.subr.mxu1 %v6704_v7 }
 0x31c   :  { %704 = vxpose.xlu1.b32.start.end [1/1] (short) (narrow) %v700_v50, 8 }
 0x31d   :  { %v6899_v51 = vpop.trf.xlu0 }
 0x31e   :  { %v701_v52 = vmul.f32 0.17677669, %v6899_v51 }
 0x320   :  { %810 = vxpose.xlu1.b32.start.end [1/1] (short) (narrow) %v701_v52, 8 }
 0x321   :  { %v6902_v53 = vpop.trf.xlu0 }
 0x322   :  { %v702_v54 = vmul.f32 0.17677669, %v6902_v53 }
 0x324   :  { %915 = vxpose.xlu1.b32.start.end [1/1] (short) (narrow) %v702_v54, 8 }
 0x325   :  { %v6905_v55 = vpop.trf.xlu0 }
 0x326   :  { %v703_v56 = vmul.f32 0.17677669, %v6905_v55 }
 0x328   :  { %1020 = vxpose.xlu1.b32.start.end [1/1] (short) (narrow) %v703_v56, 8 }
 0x39c   :  { %v720_v57 = vpop.trf.xlu1 }
 0x39d   :  { %5986 = vmatmul.mubr.msk.f32.vlgmr.msra.gmra.mrb[4].mxu1 %vm736_vm4, %v720_v57 }
 0x39e   :  { %5989 = vmatpush3.msra.mxu1 %v6899_v51  ;;  %5990 = vmatprep.mubr.msk.f32.mxu1 %vm6703_vm0, %v6704_v7 }
 0x39f   :  { %5993 = vmatprep.subr.mxu1 %v6704_v7 }
 0x3a0   :  { %v826_v58 = vpop.trf.xlu1 }
 0x3a1   :  { %5991 = vmatmul.mubr.msk.f32.vlgmr.msra.gmra.mrb[6].mxu1 %vm736_vm4, %v826_v58 }
 0x3a2   :  { %5994 = vmatpush3.msra.mxu1 %v6902_v53  ;;  %5995 = vmatprep.mubr.msk.f32.mxu1 %vm6703_vm0, %v6704_v7 }
 0x3a3   :  { %5998 = vmatprep.subr.mxu1 %v6704_v7 }
 0x3a4   :  { %v931_v59 = vpop.trf.xlu1 }
 0x3a5   :  { %5996 = vmatmul.mubr.msk.f32.vlgmr.msra.gmra.mrb[8].mxu1 %vm736_vm4, %v931_v59 }
 0x3a6   :  { %5999 = vmatpush3.msra.mxu1 %v6905_v55  ;;  %6000 = vmatprep.mubr.msk.f32.mxu1 %vm6703_vm0, %v6704_v7 }
 0x3a7   :  { %6008 = vmatprep.subr.mxu1 %v6704_v7 }
 0x3a8   :  { %v1036_v60 = vpop.trf.xlu1 }
 0x3a9   :  { %6001 = vmatmul.mubr.msk.f32.vlgmr.msra.gmra.mrb[10].mxu1 %vm736_vm4, %v1036_v60 }
 0x3aa   :  { %6010 = vmatprep.mubr.msk.f32.mxu1 %vm6703_vm0, %v6704_v7 }
 0x470   :  { %v806_v62 = vpop.f32.mrb[4].mxu1 }
 0x471   :  { %v1127_v63 = vsel %vm6928_vm5, -inf, %v806_v62  ;;  %v5987_v0 = vpop.f32.mrb[5].mxu1 }
 0x472   :  { %v1131_v2 = vsel %vm736_vm4, %v1127_v63, -inf }
 0x473   :  { %1132 = vmax.xlane.f32.xlu1 %v1131_v2 }
 0x474   :  { %v911_v3 = vpop.f32.mrb[6].mxu1 }
 0x475   :  { %v1128_v4 = vsel %vm6928_vm5, -inf, %v911_v3  ;;  %v5992_v5 = vpop.f32.mrb[7].mxu1 }
 0x476   :  { %v1134_v6 = vsel %vm736_vm4, %v1128_v4, -inf }
 0x477   :  { %1135 = vmax.xlane.f32.xlu0 %v1134_v6 }
 0x478   :  { %v1016_v8 = vpop.f32.mrb[8].mxu1 }
 0x479   :  { %v1129_v9 = vsel %vm6928_vm5, -inf, %v1016_v8  ;;  %v5997_v11 = vpop.f32.mrb[9].mxu1 }
 0x47a   :  { %v1137_v12 = vsel %vm736_vm4, %v1129_v9, -inf }
 0x47b   :  { %1138 = vmax.xlane.f32.xlu1 %v1137_v12 }
 0x47c   :  { %v1121_v14 = vpop.f32.mrb[10].mxu1 }
 0x47d   :  { %v1130_v15 = vsel %vm6928_vm5, -inf, %v1121_v14  ;;  %v6002_v16 = vpop.f32.mrb[11].mxu1 }
 0x47e   :  { %v1140_v17 = vsel %vm736_vm4, %v1130_v15, -inf }
 0x47f   :  { %1141 = vmax.xlane.f32.xlu1 %v1140_v17 }
 0x500   :  { %v1133_v20 = vpop.xlane.xlu1 %1132 }
 0x501   :  { %v1143_v22 = vsub.f32 %v1127_v63, %v1133_v20  ;;  %v87_v20 = vld [vmem:[#allocation7 + $0x20] sm:$0xff] }
 0x503   :  { %v1147_v23 = vmul.f32 1.442695, %v1143_v22  ;;  %v88_v22 = vld [vmem:[#allocation7 + $0x28] sm:$0xff] }
 0x504   :  { %v1136_v24 = vpop.xlane.xlu0 %1135 }
 0x505   :  { %6481 = vpow2.f32 %v1147_v23  ;;  %v1144_v25 = vsub.f32 %v1128_v4, %v1136_v24  ;;  %v6975_v23 = vpack.c.bf16 %v88_v22, %v87_v20  ;;  %v89_v24 = vld [vmem:[#allocation7 + $0x30] sm:$0xff]  ;;  %v98_v20 = vld [vmem:[#allocation7 + $0x78] sm:$0xff] }
 0x507   :  { %v1149_v26 = vmul.f32 1.442695, %v1144_v25  ;;  %v90_v25 = vld [vmem:[#allocation7 + $0x38] sm:$0xff] }
 0x508   :  { %v1139_v27 = vpop.xlane.xlu1 %1138 }
 0x509   :  { %6483 = vpow2.f32 %v1149_v26  ;;  %v1145_v28 = vsub.f32 %v1129_v9, %v1139_v27 }
 0x50b   :  { %v1151_v29 = vmul.f32 1.442695, %v1145_v28 }
 0x50c   :  { %v1142_v30 = vpop.xlane.xlu1 %1141 }
 0x50d   :  { %6485 = vpow2.f32 %v1151_v29  ;;  %v1146_v32 = vsub.f32 %v1130_v15, %v1142_v30  ;;  %v1528_v29 = vsub.s32 1, %v6883_v42  ;;  %v1533_v30 = vsub.s32 2, %v6883_v42 }
 0x50f   :  { %v6482_v33 = vpop.eup %6481  ;;  %v1153_v35 = vmul.f32 1.442695, %v1146_v32  ;;  %v6988_v32 = vrot.slane %v6886_v44, %v1528_v29 }
 0x510   :  { %v1155_v36 = vsel %vm736_vm4, %v6482_v33, 0.0 }
 0x511   :  { %6487 = vpow2.f32 %v1153_v35  ;;  %1156 = vadd.xlane.f32.xlu1 %v1155_v36  ;;  %v6993_v36 = vrot.slane %v6886_v44, %v1533_v30 }
 0x513   :  { %v6484_v38 = vpop.eup %6483 }
 0x514   :  { %v1158_v39 = vsel %vm736_vm4, %v6484_v38, 0.0 }
 0x515   :  { %1159 = vadd.xlane.f32.xlu1 %v1158_v39 }
 0x517   :  { %v6486_v41 = vpop.eup %6485 }
 0x518   :  { %v1161_v46 = vsel %vm736_vm4, %v6486_v41, 0.0 }
 0x519   :  { %1162 = vadd.xlane.f32.xlu1 %v1161_v46  ;;  %v92_v46 = vld [vmem:[#allocation7 + $0x48] sm:$0xff] }
 0x51b   :  { %v6488_v47 = vpop.eup %6487 }
 0x51c   :  { %v1164_v48 = vsel %vm736_vm4, %v6488_v47, 0.0 }
 0x51d   :  { %1165 = vadd.xlane.f32.xlu1 %v1164_v48  ;;  %v93_v48 = vld [vmem:[#allocation7 + $0x50] sm:$0xff] }
 0x59e   :  { %v1157_v50 = vpop.xlane.xlu1 %1156 }
 0x59f   :  { %6489 = vrcp.f32 %v1157_v50  ;;  %v94_v50 = vld [vmem:[#allocation7 + $0x58] sm:$0xff] }
 0x5a2   :  { %v1160_v52 = vpop.xlane.xlu1 %1159 }
 0x5a3   :  { %6491 = vrcp.f32 %v1160_v52  ;;  %v7004_v52 = vpack.c.bf16 %v94_v50, %v93_v48  ;;  %v1723_v48 = vsub.s32 7, %v6883_v42 }
 0x5a5   :  { %v7055_v50 = vrot.slane %v6886_v44, %v1723_v48 }
 0x5a6   :  { %v1163_v54 = vpop.xlane.xlu1 %1162 }
 0x5a7   :  { %6493 = vrcp.f32 %v1163_v54  ;;  %v1538_v54 = vsub.s32 3, %v6883_v42 }
 0x5a9   :  { %v6490_v56 = vpop.eup %6489 }
 0x5aa   :  { %v1171_v57 = vmul.f32 %v6490_v56, %v6482_v33  ;;  %v1166_v58 = vpop.xlane.xlu1 %1165  ;;  %v7012_v56 = vrot.slane %v6886_v44, %v1538_v54 }
 0x5ab   :  { %6495 = vrcp.f32 %v1166_v58 }
 0x5ac   :  { %6004 = vmatpush3.xpose.msk.msra.mxu0 %vm736_vm4, %v1171_v57 }
 0x5ad   :  { %v6492_v59 = vpop.eup %6491  ;;  %6013 = vmatprep.subr.mxu0 %v6704_v7 }
 0x5ae   :  { %v1172_v60 = vmul.f32 %v6492_v59, %v6484_v38 }
 0x5af   :  { %6006 = vmatmul.mubr.msk.f32.vlgmr.msra.gmra.mrb[2].mxu0 %vm736_vm4, %v6894_v49 }
 0x5b0   :  { %6009 = vmatpush3.xpose.msk.msra.mxu1 %vm736_vm4, %v1172_v60  ;;  %6015 = vmatprep.mubr.msk.f32.mxu0 %vm6703_vm0, %v6704_v7 }
 0x5b1   :  { %v6494_v62 = vpop.eup %6493  ;;  %6018 = vmatprep.subr.mxu1 %v6704_v7 }
 0x5b2   :  { %v1173_v63 = vmul.f32 %v6494_v62, %v6486_v41  ;;  %v91_v41 = vld [vmem:[#allocation7 + $0x40] sm:$0xff] }
 0x5b3   :  { %6011 = vmatmul.mubr.msk.f32.vlgmr.msra.gmra.mrb[12].mxu1 %vm736_vm4, %v6899_v51 }
 0x5b4   :  { %6014 = vmatpush3.xpose.msk.msra.mxu0 %vm736_vm4, %v1173_v63  ;;  %6020 = vmatprep.mubr.msk.f32.mxu1 %vm6703_vm0, %v6704_v7 }
 0x5b5   :  { %v6496_v0 = vpop.eup %6495  ;;  %6352 = vmatprep.subr.bf16.mxu0 %v6702_v1 }
 0x5b6   :  { %v1174_v49 = vmul.f32 %v6496_v0, %v6488_v47  ;;  %v7000_v47 = vpack.c.bf16 %v92_v46, %v91_v41 }
 0x5b7   :  { %6016 = vmatmul.mubr.msk.f32.vlgmr.msra.gmra.mrb[4].mxu0 %vm736_vm4, %v6902_v53 }
 0x5b8   :  { %6019 = vmatpush3.xpose.msk.msra.mxu1 %vm736_vm4, %v1174_v49  ;;  %6031 = vmatprep.mubr.msk.f32.mxu0 %vm6703_vm0, %v6704_v7 }
 0x5b9   :  { %6358 = vmatprep.subr.bf16.mxu1 %v6702_v1  ;;  %6354 = vmatpush3.bf16.msra.mxu0 %v6975_v23 }
 0x5ba   :  { %6355 = vmatprep.subr.bf16.mxu0 %v6702_v1 }
 0x5bb   :  { %6021 = vmatmul.mubr.msk.f32.vlgmr.msra.gmra.mrb[14].mxu1 %vm736_vm4, %v6905_v55 }
 0x5bc   :  { %6042 = vmatprep.mubr.msk.f32.mxu1 %vm6703_vm0, %v6704_v7  ;;  %6360 = vmatpush3.bf16.msra.mxu1 %v7000_v47 }
 0x5bd   :  { %6361 = vmatprep.subr.bf16.mxu1 %v6702_v1 }
 0x5c0   :  { %6363 = vmatpush3.bf16.msra.mxu1 %v7004_v52 }
 0x5c1   :  { %6056 = vmatprep.subr.mxu1 %v6704_v7 }
 0x682   :  { %v1247_v51 = vpop.f32.mrb[2].mxu0 }
 0x683   :  { %1479 = vxpose.xlu1.b32.start [1/4] (short) (narrow) %v1247_v51, 8  ;;  %v6007_v2 = vpop.f32.mrb[3].mxu0  ;;  %v1622_v51 = vsub.s32 4, %v6883_v42 }
 0x685   :  { %v7022_v2 = vrot.slane %v6886_v44, %v1622_v51 }
 0x686   :  { %v1323_v3 = vpop.f32.mrb[12].mxu1 }
 0x687   :  { %1480 = vxpose.xlu1.b32.cont [2/4] (short) (narrow) %v1323_v3, 8  ;;  %v6012_v4 = vpop.f32.mrb[13].mxu1 }
 0x68a   :  { %v1399_v53 = vpop.f32.mrb[4].mxu0 }
 0x68b   :  { %v6017_v5 = vpop.f32.mrb[5].mxu0  ;;  %1481 = vxpose.xlu1.b32.cont [3/4] (short) (narrow) %v1399_v53, 8 }
 0x68e   :  { %v1475_v6 = vpop.f32.mrb[14].mxu1 }
 0x68f   :  { %1482 = vxpose.xlu1.b32.end [4/4] (short) (narrow) %v1475_v6, 8  ;;  %v6022_v8 = vpop.f32.mrb[15].mxu1 }
 0x703   :  { %v1495_v9 = vpop.trf.xlu1 }
 0x704   :  { %v1511_v11 = vadd.f32 %v6877_v40, %v1495_v9  ;;  %v6979_v40 = vpack.c.bf16 %v90_v25, %v89_v24 }
 0x706   :  { %v1512_v55 = vsel %vm594_vm3, %v1511_v11, 0.0  ;;  %6357 = vmatpush3.bf16.msra.mxu0 %v6979_v40 }
 0x707   :  { %1513 = vadd.xlane.f32.xlu0 %v1512_v55  ;;  %6364 = vmatprep.subr.bf16.mxu0 %v6702_v1 }
 0x794   :  { %v1514_v12 = vpop.xlane.xlu0 %1513 }
 0x795   :  { %v1516_v14 = vmul.f32 0.03125, %v1514_v12 }
 0x797   :  { %v1517_v15 = vsub.f32 %v1511_v11, %v1516_v14  ;;  %v95_v14 = vld [vmem:[#allocation7 + $0x60] sm:$0xff] }
 0x799   :  { %v1518_v16 = vmul.f32 %v1517_v15, %v1517_v15 }
 0x79b   :  { %v1519_v17 = vsel %vm594_vm3, %v1518_v16, 0.0 }
 0x79c   :  { %1520 = vadd.xlane.f32.xlu0 %v1519_v17  ;;  %v97_v17 = vld [vmem:[#allocation7 + $0x70] sm:$0xff] }
 0x79d   :  { %v7031_v22 = vpack.c.bf16 %v98_v20, %v97_v17 }
 0x829   :  { %v1521_v26 = vpop.xlane.xlu0 %1520 }
 0x82a   :  { %v1522_v27 = vmul.f32 0.03125, %v1521_v26 }
 0x82c   :  { %v1523_v28 = vadd.f32 1e-05, %v1522_v27  ;;  %v1713_v27 = vsub.s32 5, %v6883_v42 }
 0x82e   :  { %6497 = vrsqrt.f32 %v1523_v28  ;;  %v1718_v28 = vsub.s32 6, %v6883_v42 }
 0x838   :  { %v6498_v33 = vpop.eup %6497 }
 0x839   :  { %v1525_v35 = vmul.f32 %v6498_v33, %v1517_v15  ;;  %v96_v15 = vld [vmem:[#allocation7 + $0x68] sm:$0xff]  ;;  %v7040_v33 = vrot.slane %v6886_v44, %v1713_v27 }
 0x83a   :  { %v7027_v16 = vpack.c.bf16 %v96_v15, %v95_v14 }
 0x83b   :  { %v1530_v38 = vmul.f32 %v6988_v32, %v1525_v35 }
 0x83d   :  { %v1535_v39 = vadd.f32 %v6993_v36, %v1530_v38 }
 0x83f   :  { %6032 = vmatmul.mubr.msk.f32.vlgmr.msra.gmra.mrb[6].mxu0 %vm594_vm3, %v1535_v39 }
 0x840   :  { %6053 = vmatprep.mubr.msk.f32.mxu0 %vm6703_vm0, %v6704_v7  ;;  %6366 = vmatpush3.bf16.msra.mxu0 %v7027_v16 }
 0x841   :  { %6367 = vmatprep.subr.bf16.mxu0 %v6702_v1 }
 0x844   :  { %6369 = vmatpush3.bf16.msra.mxu0 %v7031_v22 }
 0x845   :  { %6066 = vmatprep.subr.mxu0 %v6704_v7 }
 0x912   :  { %v1609_v57 = vpop.f32.mrb[6].mxu0 }
 0x913   :  { %v1610_v58 = vadd.f32 %v1609_v57, %v7012_v56  ;;  %v6033_v59 = vpop.f32.mrb[7].mxu0 }
 0x915   :  { %v5703_v60 = vmul.f32 -1.442695, %v1610_v58 }
 0x917   :  { %6499 = vpow2.f32 %v5703_v60 }
 0x921   :  { %v6500_v62 = vpop.eup %6499 }
 0x922   :  { %v1616_v63 = vadd.f32 1.0, %v6500_v62 }
 0x924   :  { %6501 = vrcp.f32 %v1616_v63 }
 0x92e   :  { %v6502_v0 = vpop.eup %6501 }
 0x92f   :  { %v1619_v49 = vmul.f32 %v6502_v0, %v1610_v58 }
 0x931   :  { %6043 = vmatmul.mubr.msk.f32.vlgmr.msra.gmra.mrb[16].mxu1 %vm594_vm3, %v1619_v49 }
 0x932   :  { %6058 = vmatprep.mubr.msk.f32.mxu1 %vm6703_vm0, %v6704_v7 }
 0xa04   :  { %v1693_v3 = vpop.f32.mrb[16].mxu1 }
 0xa05   :  { %v1694_v4 = vadd.f32 %v1693_v3, %v7022_v2  ;;  %v6044_v53 = vpop.f32.mrb[17].mxu1 }
 0xa07   :  { %v1697_v5 = vadd.f32 %v1694_v4, %v1535_v39  ;;  %v7043_v39 = vrot.slane %v6886_v44, %v1718_v28 }
 0xa09   :  { %v1698_v6 = vsel %vm594_vm3, %v1697_v5, 0.0 }
 0xa0a   :  { %1699 = vadd.xlane.f32.xlu0 %v1698_v6 }
 0xa97   :  { %v1700_v8 = vpop.xlane.xlu0 %1699 }
 0xa98   :  { %v1701_v9 = vmul.f32 0.03125, %v1700_v8 }
 0xa9a   :  { %v1702_v11 = vsub.f32 %v1697_v5, %v1701_v9 }
 0xa9c   :  { %v1703_v55 = vmul.f32 %v1702_v11, %v1702_v11 }
 0xa9e   :  { %v1704_v12 = vsel %vm594_vm3, %v1703_v55, 0.0 }
 0xa9f   :  { %1705 = vadd.xlane.f32.xlu0 %v1704_v12 }
 0xb2c   :  { %v1706_v24 = vpop.xlane.xlu0 %1705 }
 0xb2d   :  { %v1707_v25 = vmul.f32 0.03125, %v1706_v24 }
 0xb2f   :  { %v1708_v26 = vadd.f32 1e-05, %v1707_v25 }
 0xb31   :  { %6503 = vrsqrt.f32 %v1708_v26 }
 0xb3b   :  { %v6504_v35 = vpop.eup %6503 }
 0xb3c   :  { %v1710_v38 = vmul.f32 %v6504_v35, %v1702_v11 }
 0xb3e   :  { %v1715_v41 = vmul.f32 %v7040_v33, %v1710_v38 }
 0xb40   :  { %v7047_v46 = vadd.f32 %v7043_v39, %v1715_v41 }
 0xb42   :  { %6054 = vmatmul.mubr.msk.f32.vlgmr.msra.gmra.mrb[8].mxu0 %vm594_vm3, %v7047_v46 }
 0xb43   :  { %6068 = vmatprep.mubr.msk.f32.mxu0 %vm6703_vm0, %v6704_v7 }
 0xc15   :  { %v1794_v57 = vpop.f32.mrb[8].mxu0 }
 0xc16   :  { %v1795_v58 = vadd.f32 %v1794_v57, %v7055_v50  ;;  %v6055_v59 = vpop.f32.mrb[9].mxu0 }
 0xc18   :  { %1798 = vxpose.xlu0.b32.start.end [1/1] (short) (narrow) %v1795_v58, 32 }
 0xc98   :  { %v7058_v60 = vpop.trf.xlu0 }
 0xc99   :  { %6057 = vmatpush3.msra.mxu1 %v7058_v60  ;;  %v1830_v62 = vmul.f32 0.17677669, %v7058_v60 }
 0xc9a   :  { %6061 = vmatprep.subr.mxu1 %v6704_v7 }
 0xc9b   :  { %1834 = vxpose.xlu1.b32.start.end [1/1] (short) (narrow) %v1830_v62, 8 }
 0xc9c   :  { %v7063_v63 = vpop.trf.xlu0 }
 0xc9d   :  { %v1831_v0 = vmul.f32 0.17677669, %v7063_v63 }
 0xc9f   :  { %1939 = vxpose.xlu1.b32.start.end [1/1] (short) (narrow) %v1831_v0, 8 }
 0xca0   :  { %v7066_v44 = vpop.trf.xlu0 }
 0xca1   :  { %6067 = vmatpush3.msra.mxu0 %v7066_v44  ;;  %v1832_v49 = vmul.f32 0.17677669, %v7066_v44 }
 0xca2   :  { %6076 = vmatprep.subr.mxu0 %v6704_v7 }
 0xca3   :  { %2044 = vxpose.xlu1.b32.start.end [1/1] (short) (narrow) %v1832_v49, 8 }
 0xca4   :  { %v7071_v3 = vpop.trf.xlu0 }
 0xca5   :  { %v1833_v4 = vmul.f32 0.17677669, %v7071_v3 }
 0xca7   :  { %2149 = vxpose.xlu0.b32.start.end [1/1] (short) (narrow) %v1833_v4, 8 }
 0xd1b   :  { %v1850_v53 = vpop.trf.xlu1 }
 0xd1c   :  { %6059 = vmatmul.mubr.msk.f32.vlgmr.msra.gmra.mrb[18].mxu1 %vm736_vm4, %v1850_v53 }
 0xd1d   :  { %6062 = vmatpush3.msra.mxu1 %v7063_v63  ;;  %6063 = vmatprep.mubr.msk.f32.mxu1 %vm6703_vm0, %v6704_v7 }
 0xd1e   :  { %6071 = vmatprep.subr.mxu1 %v6704_v7 }
 0xd1f   :  { %v1955_v5 = vpop.trf.xlu1 }
 0xd20   :  { %6064 = vmatmul.mubr.msk.f32.vlgmr.msra.gmra.mrb[20].mxu1 %vm736_vm4, %v1955_v5 }
 0xd21   :  { %6072 = vmatpush3.msra.mxu1 %v7071_v3  ;;  %6073 = vmatprep.mubr.msk.f32.mxu1 %vm6703_vm0, %v6704_v7 }
 0xd22   :  { %6081 = vmatprep.subr.mxu1 %v6704_v7 }
 0xd23   :  { %v2060_v6 = vpop.trf.xlu1 }
 0xd24   :  { %6069 = vmatmul.mubr.msk.f32.vlgmr.msra.gmra.mrb[10].mxu0 %vm736_vm4, %v2060_v6 }
 0xd25   :  { %6078 = vmatprep.mubr.msk.f32.mxu0 %vm6703_vm0, %v6704_v7 }
 0xd27   :  { %v2165_v8 = vpop.trf.xlu0 }
 0xd28   :  { %6074 = vmatmul.mubr.msk.f32.vlgmr.msra.gmra.mrb[22].mxu1 %vm736_vm4, %v2165_v8 }
 0xd29   :  { %6083 = vmatprep.mubr.msk.f32.mxu1 %vm6703_vm0, %v6704_v7 }
 0xdef   :  { %v1935_v9 = vpop.f32.mrb[18].mxu1 }
 0xdf0   :  { %v2254_v11 = vsel %vm6928_vm5, -inf, %v1935_v9  ;;  %v6060_v55 = vpop.f32.mrb[19].mxu1 }
 0xdf1   :  { %v2258_v12 = vsel %vm736_vm4, %v2254_v11, -inf }
 0xdf2   :  { %2259 = vmax.xlane.f32.xlu1 %v2258_v12 }
 0xdf3   :  { %v2040_v14 = vpop.f32.mrb[20].mxu1 }
 0xdf4   :  { %v2255_v15 = vsel %vm6928_vm5, -inf, %v2040_v14  ;;  %v6065_v17 = vpop.f32.mrb[21].mxu1 }
 0xdf5   :  { %v2261_v20 = vsel %vm736_vm4, %v2255_v15, -inf }
 0xdf6   :  { %2262 = vmax.xlane.f32.xlu0 %v2261_v20 }
 0xdf7   :  { %v2145_v24 = vpop.f32.mrb[10].mxu0 }
 0xdf8   :  { %v2256_v25 = vsel %vm6928_vm5, -inf, %v2145_v24  ;;  %v6070_v26 = vpop.f32.mrb[11].mxu0 }
 0xdf9   :  { %v2264_v28 = vsel %vm736_vm4, %v2256_v25, -inf }
 0xdfa   :  { %2265 = vmax.xlane.f32.xlu1 %v2264_v28 }
 0xdfb   :  { %v2250_v35 = vpop.f32.mrb[22].mxu1 }
 0xdfc   :  { %v2257_v38 = vsel %vm6928_vm5, -inf, %v2250_v35  ;;  %v6075_v41 = vpop.f32.mrb[23].mxu1 }
 0xdfd   :  { %v2267_v48 = vsel %vm736_vm4, %v2257_v38, -inf }
 0xdfe   :  { %2268 = vmax.xlane.f32.xlu1 %v2267_v48 }
 0xe7f   :  { %v2260_v57 = vpop.xlane.xlu1 %2259 }
 0xe80   :  { %v2270_v58 = vsub.f32 %v2254_v11, %v2260_v57 }
 0xe82   :  { %v2274_v59 = vmul.f32 1.442695, %v2270_v58 }
 0xe83   :  { %v2263_v62 = vpop.xlane.xlu0 %2262 }
 0xe84   :  { %6505 = vpow2.f32 %v2274_v59  ;;  %v2271_v0 = vsub.f32 %v2255_v15, %v2263_v62 }
 0xe86   :  { %v2276_v49 = vmul.f32 1.442695, %v2271_v0 }
 0xe87   :  { %v2266_v4 = vpop.xlane.xlu1 %2265 }
 0xe88   :  { %6507 = vpow2.f32 %v2276_v49  ;;  %v2272_v53 = vsub.f32 %v2256_v25, %v2266_v4 }
 0xe8a   :  { %v2278_v5 = vmul.f32 1.442695, %v2272_v53 }
 0xe8b   :  { %v2269_v6 = vpop.xlane.xlu1 %2268 }
 0xe8c   :  { %6509 = vpow2.f32 %v2278_v5  ;;  %v2273_v8 = vsub.f32 %v2257_v38, %v2269_v6 }
 0xe8e   :  { %v6506_v9 = vpop.eup %6505  ;;  %v2280_v55 = vmul.f32 1.442695, %v2273_v8 }
 0xe8f   :  { %v2282_v12 = vsel %vm736_vm4, %v6506_v9, 0.0 }
 0xe90   :  { %6511 = vpow2.f32 %v2280_v55  ;;  %2283 = vadd.xlane.f32.xlu1 %v2282_v12 }
 0xe92   :  { %v6508_v14 = vpop.eup %6507 }
 0xe93   :  { %v2285_v11 = vsel %vm736_vm4, %v6508_v14, 0.0 }
 0xe94   :  { %2286 = vadd.xlane.f32.xlu1 %v2285_v11 }
 0xe96   :  { %v6510_v17 = vpop.eup %6509 }
 0xe97   :  { %v2288_v15 = vsel %vm736_vm4, %v6510_v17, 0.0 }
 0xe98   :  { %2289 = vadd.xlane.f32.xlu1 %v2288_v15  ;;  %v115_v15 = vld [vmem:[%s7491_s0 + $0x8] sm:$0xff] }
 0xe9a   :  { %v6512_v20 = vpop.eup %6511 }
 0xe9b   :  { %v2291_v24 = vsel %vm736_vm4, %v6512_v20, 0.0 }
 0xe9c   :  { %2292 = vadd.xlane.f32.xlu0 %v2291_v24  ;;  %v100_v24 = vld [vmem:[#allocation7 + $0x88] sm:$0xff] }
 0xf1d   :  { %v2284_v25 = vpop.xlane.xlu1 %2283 }
 0xf1e   :  { %6513 = vrcp.f32 %v2284_v25 }
 0xf21   :  { %v2287_v26 = vpop.xlane.xlu1 %2286 }
 0xf22   :  { %6515 = vrcp.f32 %v2287_v26  ;;  %v102_v26 = vld [vmem:[#allocation7 + $0x98] sm:$0xff] }
 0xf25   :  { %v2290_v28 = vpop.xlane.xlu1 %2289 }
 0xf26   :  { %6517 = vrcp.f32 %v2290_v28 }
 0xf28   :  { %v6514_v35 = vpop.eup %6513 }
 0xf29   :  { %v2298_v38 = vmul.f32 %v6514_v35, %v6506_v9  ;;  %v2293_v41 = vpop.xlane.xlu0 %2292 }
 0xf2a   :  { %6519 = vrcp.f32 %v2293_v41 }
 0xf2b   :  { %6077 = vmatpush3.xpose.msk.msra.mxu0 %vm736_vm4, %v2298_v38 }
 0xf2c   :  { %v6516_v48 = vpop.eup %6515  ;;  %6086 = vmatprep.subr.mxu0 %v6704_v7 }
 0xf2d   :  { %v2299_v57 = vmul.f32 %v6516_v48, %v6508_v14  ;;  %v7144_v48 = vld [vmem:[#allocation8 + $0x8] sm:$0x3f] }
 0xf2e   :  { %6079 = vmatmul.mubr.msk.f32.vlgmr.msra.gmra.mrb[12].mxu0 %vm736_vm4, %v7058_v60 }
 0xf2f   :  { %6082 = vmatpush3.xpose.msk.msra.mxu1 %vm736_vm4, %v2299_v57  ;;  %6088 = vmatprep.mubr.msk.f32.mxu0 %vm6703_vm0, %v6704_v7  ;;  %v7149_v57 = vrot.slane %v7144_v48, %v592_v43 }
 0xf30   :  { %v6518_v58 = vpop.eup %6517  ;;  %6091 = vmatprep.subr.mxu1 %v6704_v7 }
 0xf31   :  { %v2300_v59 = vmul.f32 %v6518_v58, %v6510_v17 }
 0xf32   :  { %6084 = vmatmul.mubr.msk.f32.vlgmr.msra.gmra.mrb[24].mxu1 %vm736_vm4, %v7063_v63 }
 0xf33   :  { %6087 = vmatpush3.xpose.msk.msra.mxu0 %vm736_vm4, %v2300_v59  ;;  %6093 = vmatprep.mubr.msk.f32.mxu1 %vm6703_vm0, %v6704_v7 }
 0xf34   :  { %v6520_v62 = vpop.eup %6519  ;;  %6370 = vmatprep.subr.bf16.mxu0 %v6702_v1 }
 0xf35   :  { %v2301_v60 = vmul.f32 %v6520_v62, %v6512_v20  ;;  %v99_v20 = vld [vmem:[#allocation7 + $0x80] sm:$0xff]  ;;  %v7154_v62 = vrot.slane %v7144_v48, %v1528_v29  ;;  %v106_v29 = vld [vmem:[#allocation7 + $0xb8] sm:$0xff] }
 0xf36   :  { %6089 = vmatmul.mubr.msk.f32.vlgmr.msra.gmra.mrb[14].mxu0 %vm736_vm4, %v7066_v44  ;;  %v7136_v25 = vpack.c.bf16 %v100_v24, %v99_v20 }
 0xf37   :  { %6092 = vmatpush3.xpose.msk.msra.mxu1 %vm736_vm4, %v2301_v60  ;;  %6104 = vmatprep.mubr.msk.f32.mxu0 %vm6703_vm0, %v6704_v7 }
 0xf38   :  { %6376 = vmatprep.subr.bf16.mxu1 %v6702_v1  ;;  %6372 = vmatpush3.bf16.msra.mxu0 %v7136_v25 }
 0xf39   :  { %6373 = vmatprep.subr.bf16.mxu0 %v6702_v1 }
 0xf3a   :  { %6094 = vmatmul.mubr.msk.f32.vlgmr.msra.gmra.mrb[26].mxu1 %vm736_vm4, %v7071_v3 }
 0xf3b   :  { %6115 = vmatprep.mubr.msk.f32.mxu1 %vm6703_vm0, %v6704_v7 }
0x1001   :  { %v2374_v63 = vpop.f32.mrb[12].mxu0 }
0x1002   :  { %2606 = vxpose.xlu1.b32.start [1/4] (short) (narrow) %v2374_v63, 8  ;;  %v6080_v0 = vpop.f32.mrb[13].mxu0 }
0x1003   :  { %v103_v0 = vld [vmem:[#allocation7 + $0xa0] sm:$0xff] }
0x1005   :  { %v2450_v49 = vpop.f32.mrb[24].mxu1 }
0x1006   :  { %2607 = vxpose.xlu1.b32.cont [2/4] (short) (narrow) %v2450_v49, 8  ;;  %v6085_v4 = vpop.f32.mrb[25].mxu1  ;;  %v104_v49 = vld [vmem:[#allocation7 + $0xa8] sm:$0xff] }
0x1007   :  { %v7161_v43 = vpack.c.bf16 %v104_v49, %v103_v0  ;;  %v105_v4 = vld [vmem:[#allocation7 + $0xb0] sm:$0xff] }
0x1009   :  { %v2526_v44 = vpop.f32.mrb[14].mxu0  ;;  %6378 = vmatpush3.bf16.msra.mxu1 %v7161_v43 }
0x100a   :  { %v6090_v53 = vpop.f32.mrb[15].mxu0  ;;  %2608 = vxpose.xlu1.b32.cont [3/4] (short) (narrow) %v2526_v44, 8  ;;  %6379 = vmatprep.subr.bf16.mxu1 %v6702_v1  ;;  %v7165_v44 = vpack.c.bf16 %v106_v29, %v105_v4  ;;  %v111_v4 = vld [vmem:[%s7496_s5 + $0x10] sm:$0xff]  ;;  %v112_v29 = vld [vmem:[%s7496_s5 + $0x18] sm:$0xff] }
0x100b   :  { %v7172_v53 = vrot.slane %v7144_v48, %v1533_v30 }
0x100d   :  { %v2602_v5 = vpop.f32.mrb[26].mxu1  ;;  %6381 = vmatpush3.bf16.msra.mxu1 %v7165_v44 }
0x100e   :  { %2609 = vxpose.xlu1.b32.end [4/4] (short) (narrow) %v2602_v5, 8  ;;  %v6095_v6 = vpop.f32.mrb[27].mxu1  ;;  %6388 = vmatprep.subr.bf16.mxu1 %v6702_v1 }
0x1082   :  { %v2622_v8 = vpop.trf.xlu1 }
0x1083   :  { %v2638_v9 = vadd.f32 %v2622_v8, %v7047_v46  ;;  %v101_v46 = vld [vmem:[#allocation7 + $0x90] sm:$0xff] }
0x1084   :  { %v7140_v28 = vpack.c.bf16 %v102_v26, %v101_v46 }
0x1085   :  { %v2639_v3 = vsel %vm594_vm3, %v2638_v9, 0.0 }
0x1086   :  { %2640 = vadd.xlane.f32.xlu0 %v2639_v3  ;;  %6375 = vmatpush3.bf16.msra.mxu0 %v7140_v28 }
0x1087   :  { %6382 = vmatprep.subr.bf16.mxu0 %v6702_v1 }
0x1113   :  { %v2641_v55 = vpop.xlane.xlu0 %2640 }
0x1114   :  { %v2642_v12 = vmul.f32 0.03125, %v2641_v55 }
0x1116   :  { %v2643_v14 = vsub.f32 %v2638_v9, %v2642_v12 }
0x1118   :  { %v2644_v11 = vmul.f32 %v2643_v14, %v2643_v14 }
0x111a   :  { %v2645_v17 = vsel %vm594_vm3, %v2644_v11, 0.0 }
0x111b   :  { %2646 = vadd.xlane.f32.xlu0 %v2645_v17 }
0x1131   :  { %2928 = vperm.xlu0 %6480, %v115_v15  }
0x11a8   :  { %v2647_v35 = vpop.xlane.xlu0 %2646 }
0x11a9   :  { %v2648_v38 = vmul.f32 0.03125, %v2647_v35 }
0x11ab   :  { %v2649_v41 = vadd.f32 1e-05, %v2648_v38 }
0x11ad   :  { %6521 = vrsqrt.f32 %v2649_v41 }
0x11b0   :  { %v2929_v3 = vpop.permute.xlu0 %2928 }
0x11b1   :  { %vm2930_vm6 = vcmp.eq.s32.totalorder %v2929_v3, %v6838_v21  ;;  %v7239_v3 = vrot.slane %v7144_v48, %v1622_v51 }
0x11b2   :  { %v5723_v12 = vsel %vm2930_vm6, 1.0, %v6704_v7 }
0x11b3   :  { %v2934_v11 = vsel %vm127_vm1, %v5723_v12, 0 }
0x11b4   :  { %v3004_v17 = vsub.f32 %v2934_v11, %v2934_v11 }
0x11b6   :  { %v3005_v15 = vand.u32 4294901760, %v3004_v17 }
0x11b7   :  { %v6522_v58 = vpop.eup %6521 }
0x11b8   :  { %v2651_v59 = vmul.f32 %v6522_v58, %v2643_v14  ;;  %v3006_v24 = vsub.f32 %v3004_v17, %v3005_v15 }
0x11ba   :  { %v2656_v60 = vmul.f32 %v7149_v57, %v2651_v59  ;;  %v3007_v21 = vand.u32 4294901760, %v3006_v24 }
0x11bc   :  { %v2661_v63 = vadd.f32 %v7154_v62, %v2656_v60 }
0x11be   :  { %6105 = vmatmul.mubr.msk.f32.vlgmr.msra.gmra.mrb[16].mxu0 %vm594_vm3, %v2661_v63 }
0x11bf   :  { %6126 = vmatprep.mubr.msk.f32.mxu0 %vm6703_vm0, %v6704_v7 }
0x1291   :  { %v2735_v5 = vpop.f32.mrb[16].mxu0 }
0x1292   :  { %v2736_v6 = vadd.f32 %v2735_v5, %v7172_v53  ;;  %v6106_v8 = vpop.f32.mrb[17].mxu0  ;;  %v7232_v5 = vpack.c.bf16 %v112_v29, %v111_v4 }
0x1294   :  { %v5719_v9 = vmul.f32 -1.442695, %v2736_v6 }
0x1296   :  { %6523 = vpow2.f32 %v5719_v9 }
0x12a0   :  { %v6524_v55 = vpop.eup %6523 }
0x12a1   :  { %v2742_v14 = vadd.f32 1.0, %v6524_v55 }
0x12a3   :  { %6525 = vrcp.f32 %v2742_v14  ;;  %v7244_v14 = vrot.slane %v7144_v48, %v1713_v27 }
0x12ad   :  { %v6526_v30 = vpop.eup %6525 }
0x12ae   :  { %v2745_v20 = vmul.f32 %v6526_v30, %v2736_v6 }
0x12b0   :  { %6116 = vmatmul.mubr.msk.f32.vlgmr.msra.gmra.mrb[28].mxu1 %vm594_vm3, %v2745_v20 }
0x12b1   :  { %6390 = vmatpush3.bf16.msra.mxu1 %v6826_v10  ;;  %6133 = vmatprep.mubr.msk.f32.mxu1 %vm6703_vm0, %v6704_v7 }
0x12b2   :  { %6391 = vmatprep.subr.bf16.mxu1 %v6702_v1 }
0x12b4   :  { %6134 = vmatmul.mubr.f32.vlgmr.msra.gmra.mrb[30].mxu1 %v3007_v21 }
0x12b5   :  { %6393 = vmatpush3.bf16.msra.mxu1 %v6832_v18  ;;  %6140 = vmatprep.mubr.msk.f32.mxu1 %vm6703_vm0, %v6704_v7 }
0x12b6   :  { %6394 = vmatprep.subr.bf16.mxu1 %v6702_v1 }
0x12bc   :  { %6141 = vmatmul.mubr.msk.f32.vlgmr.msra.gmra.mrb[30].mxu1 %vm127_vm1, %v5723_v12 }
0x12bd   :  { %6396 = vmatpush3.bf16.msra.mxu1 %v6828_v13  ;;  %6147 = vmatprep.mubr.msk.f32.mxu1 %vm6703_vm0, %v6704_v7  ;;  %v7211_v13 = vrot.slane %v7144_v48, %v1538_v54  ;;  %v109_v54 = vld [vmem:[%s7496_s5] sm:$0xff] }
0x12be   :  { %6397 = vmatprep.subr.bf16.mxu1 %v6702_v1 }
0x12c4   :  { %6148 = vmatmul.mubr.f32.vlgmr.msra.gmra.mrb[30].mxu1 %v3004_v17 }
0x12c5   :  { %6399 = vmatpush3.bf16.msra.mxu1 %v6826_v10  ;;  %6154 = vmatprep.mubr.msk.f32.mxu1 %vm6703_vm0, %v6704_v7 }
0x12c6   :  { %6400 = vmatprep.subr.bf16.mxu1 %v6702_v1 }
0x12cc   :  { %6155 = vmatmul.mubr.f32.vlgmr.msra.gmra.mrb[30].mxu1 %v3005_v15 }
0x12cd   :  { %6402 = vmatpush3.bf16.msra.mxu1 %v6836_v19  ;;  %6161 = vmatprep.mubr.msk.f32.mxu1 %vm6703_vm0, %v6704_v7 }
0x12ce   :  { %6403 = vmatprep.subr.bf16.mxu1 %v6702_v1 }
0x12d4   :  { %6162 = vmatmul.mubr.msk.f32.vlgmr.msra.gmra.mrb[30].mxu1 %vm127_vm1, %v5723_v12 }
0x12d5   :  { %6405 = vmatpush3.bf16.msra.mxu1 %v6826_v10  ;;  %6168 = vmatprep.mubr.msk.f32.mxu1 %vm6703_vm0, %v6704_v7 }
0x12d6   :  { %6197 = vmatprep.subr.mxu1 %v6704_v7 }
0x12dc   :  { %6169 = vmatmul.mubr.msk.f32.vlgmr.msra.gmra.mrb[30].mxu1 %vm127_vm1, %v5723_v12 }
0x12dd   :  { %6199 = vmatprep.mubr.msk.f32.mxu1 %vm6703_vm0, %v6704_v7 }
0x1383   :  { %v2819_v18 = vpop.f32.mrb[28].mxu1 }
0x1384   :  { %v2820_v19 = vadd.f32 %v2819_v18, %v7211_v13  ;;  %v6117_v46 = vpop.f32.mrb[29].mxu1 }
0x1386   :  { %v2823_v10 = vadd.f32 %v2820_v19, %v2661_v63  ;;  %v110_v63 = vld [vmem:[%s7496_s5 + $0x8] sm:$0xff] }
0x1387   :  { %v7222_v49 = vpack.c.bf16 %v110_v63, %v109_v54 }
0x1388   :  { %v2824_v26 = vsel %vm594_vm3, %v2823_v10, 0.0 }
0x1389   :  { %2825 = vadd.xlane.f32.xlu0 %v2824_v26  ;;  %6384 = vmatpush3.bf16.msra.mxu0 %v7222_v49 }
0x138a   :  { %6385 = vmatprep.subr.bf16.mxu0 %v6702_v1 }
0x138d   :  { %6387 = vmatpush3.bf16.msra.mxu0 %v7232_v5 }
0x138e   :  { %6406 = vmatprep.subr.bf16.mxu0 %v6702_v1 }
0x13af   :  { %v3391_v35 = vpop.f32.mrb[30].mxu1 }
0x13b0   :  { %v6170_v38 = vpop.f32.mrb[31].mxu1  ;;  %v7255_v42 = vadd.f32 %v3391_v35, %v6874_v37 }
0x1416   :  { %v2826_v41 = vpop.xlane.xlu0 %2825 }
0x1417   :  { %v2827_v58 = vmul.f32 0.03125, %v2826_v41 }
0x1419   :  { %v2828_v59 = vsub.f32 %v2823_v10, %v2827_v58 }
0x141b   :  { %v2829_v60 = vmul.f32 %v2828_v59, %v2828_v59 }
0x141d   :  { %v2830_v0 = vsel %vm594_vm3, %v2829_v60, 0.0 }
0x141e   :  { %2831 = vadd.xlane.f32.xlu0 %v2830_v0 }
0x14ab   :  { %v2832_v6 = vpop.xlane.xlu0 %2831 }
0x14ac   :  { %v2833_v8 = vmul.f32 0.03125, %v2832_v6 }
0x14ae   :  { %v2834_v9 = vadd.f32 1e-05, %v2833_v8 }
0x14b0   :  { %6527 = vrsqrt.f32 %v2834_v9 }
0x14ba   :  { %v6528_v55 = vpop.eup %6527 }
0x14bb   :  { %v2836_v12 = vmul.f32 %v6528_v55, %v2828_v59 }
0x14bd   :  { %v2841_v11 = vmul.f32 %v7239_v3, %v2836_v12 }
0x14bf   :  { %v2846_v17 = vadd.f32 %v7244_v14, %v2841_v11 }
0x14c1   :  { %6127 = vmatmul.mubr.msk.f32.vlgmr.msra.gmra.mrb[18].mxu0 %vm594_vm3, %v2846_v17 }
0x14c2   :  { %6408 = vmatpush3.bf16.msra.mxu0 %v6866_v31  ;;  %6179 = vmatprep.mubr.msk.f32.mxu0 %vm6703_vm0, %v6704_v7  ;;  %v7265_v31 = vld [vmem:[%s7497_s6] ss:$0 sm:$0xff]  ;;  %s6705_s6 = smov [#allocation10]  }
0x14c3   :  { %6409 = vmatprep.subr.bf16.mxu0 %v6702_v1  ;;  %s5671_s1 = sshll.u32 %s6705_s6, 4  ;;  %s5672_s1 = int_to_ptr.vmem [resolvable:$true] %s5671_s1 }
0x14c4   :  { %s6665_s27 = scalar_lea.vmem %s5672_s1, 256  ;;  %p6670_p5 = scmp.lt.s32.totalorder %s5672_s1, %s5672_s1 }
0x14c5   :  { %p6666_p4 = scmp.ne.s32.totalorder %s5672_s1, %s6665_s27  ;;  %p6671_p6 = scmp.lt.s32.totalorder %s6665_s27, %s6665_s27 }
0x14c6   :  { %6411 = vmatpush3.bf16.msra.mxu0 %v6870_v34 }
0x14c7   :  { %6182 = vmatprep.subr.mxu0 %v6704_v7  ;;  %p6672_p7 = por %p6671_p6, %p6670_p5 }
0x14c9   :  { %6180 = vmatmul.mubr.msk.f32.vlgmr.msra.gmra.mrb[20].mxu0 %vm594_vm3, %v7255_v42  ;;  %p6673_p8 = pnand %p6672_p7, %p6666_p4 }
0x14ca   :  { %6184 = vmatprep.mubr.msk.f32.mxu0 %vm6703_vm0, %v6704_v7 }
0x1594   :  { %v2922_v51 = vpop.f32.mrb[18].mxu0 }
0x1595   :  { %v2923_v27 = vadd.f32 %v7265_v31, %v2922_v51  ;;  %v6128_v34 = vpop.f32.mrb[19].mxu0 }
0x1597   :  { %2926 = vst [vmem:[#allocation10] sm:$0xff] %v2923_v27 }
0x159c   :  { %v3464_v37 = vpop.f32.mrb[20].mxu0 }
0x159d   :  { %v3465_v48 = vadd.f32 %v3464_v37, %v6891_v45  ;;  %v6181_v15 = vpop.f32.mrb[21].mxu0 }
0x159f   :  { %3468 = vxpose.xlu1.b32.start.end [1/1] (short) (narrow) %v3465_v48, 32 }
0x161f   :  { %v7269_v30 = vpop.trf.xlu1 }
0x1620   :  { %v3500_v20 = vmul.f32 0.17677669, %v7269_v30  ;;  %6183 = vmatpush3.msra.mxu0 %v7269_v30 }
0x1621   :  { %6187 = vmatprep.subr.mxu0 %v6704_v7 }
0x1622   :  { %3504 = vxpose.xlu0.b32.start.end [1/1] (short) (narrow) %v3500_v20, 8 }
0x1623   :  { %v7274_v24 = vpop.trf.xlu1 }
0x1624   :  { %v3501_v21 = vmul.f32 0.17677669, %v7274_v24 }
0x1626   :  { %3609 = vxpose.xlu1.b32.start.end [1/1] (short) (narrow) %v3501_v21, 8 }
0x1627   :  { %v7277_v18 = vpop.trf.xlu1 }
0x1628   :  { %v3502_v45 = vmul.f32 0.17677669, %v7277_v18 }
0x162a   :  { %3714 = vxpose.xlu1.b32.start.end [1/1] (short) (narrow) %v3502_v45, 8 }
0x162b   :  { %v7280_v19 = vpop.trf.xlu1 }
0x162c   :  { %6198 = vmatpush3.msra.mxu1 %v7280_v19  ;;  %v3503_v46 = vmul.f32 0.17677669, %v7280_v19 }
0x162d   :  { %6207 = vmatprep.subr.mxu1 %v6704_v7 }
0x162e   :  { %3819 = vxpose.xlu1.b32.start.end [1/1] (short) (narrow) %v3503_v46, 8 }
0x16a2   :  { %v3520_v10 = vpop.trf.xlu0 }
0x16a3   :  { %6185 = vmatmul.mubr.msk.f32.vlgmr.msra.gmra.mrb[22].mxu0 %vm736_vm4, %v3520_v10 }
0x16a4   :  { %6188 = vmatpush3.msra.mxu0 %v7274_v24  ;;  %6189 = vmatprep.mubr.msk.f32.mxu0 %vm6703_vm0, %v6704_v7 }
0x16a5   :  { %6192 = vmatprep.subr.mxu0 %v6704_v7 }
0x16a6   :  { %v3625_v26 = vpop.trf.xlu1 }
0x16a7   :  { %6190 = vmatmul.mubr.msk.f32.vlgmr.msra.gmra.mrb[24].mxu0 %vm736_vm4, %v3625_v26 }
0x16a8   :  { %6193 = vmatpush3.msra.mxu0 %v7277_v18  ;;  %6194 = vmatprep.mubr.msk.f32.mxu0 %vm6703_vm0, %v6704_v7 }
0x16a9   :  { %6202 = vmatprep.subr.mxu0 %v6704_v7 }
0x16aa   :  { %v3730_v35 = vpop.trf.xlu1 }
0x16ab   :  { %6195 = vmatmul.mubr.msk.f32.vlgmr.msra.gmra.mrb[26].mxu0 %vm736_vm4, %v3730_v35 }
0x16ac   :  { %6204 = vmatprep.mubr.msk.f32.mxu0 %vm6703_vm0, %v6704_v7 }
0x16ae   :  { %v3835_v38 = vpop.trf.xlu1 }
0x16af   :  { %6200 = vmatmul.mubr.msk.f32.vlgmr.msra.gmra.mrb[32].mxu1 %vm736_vm4, %v3835_v38 }
0x16b0   :  { %6209 = vmatprep.mubr.msk.f32.mxu1 %vm6703_vm0, %v6704_v7 }
0x1776   :  { %v3605_v41 = vpop.f32.mrb[22].mxu0 }
0x1777   :  { %v3924_v58 = vsel %vm6928_vm5, -inf, %v3605_v41  ;;  %v6186_v59 = vpop.f32.mrb[23].mxu0 }
0x1778   :  { %v3928_v60 = vsel %vm736_vm4, %v3924_v58, -inf }
0x1779   :  { %3929 = vmax.xlane.f32.xlu1 %v3928_v60 }
0x177a   :  { %v3710_v0 = vpop.f32.mrb[24].mxu0 }
0x177b   :  { %v3925_v54 = vsel %vm6928_vm5, -inf, %v3710_v0  ;;  %v6191_v63 = vpop.f32.mrb[25].mxu0 }
0x177c   :  { %v3931_v4 = vsel %vm736_vm4, %v3925_v54, -inf }
0x177d   :  { %3932 = vmax.xlane.f32.xlu0 %v3931_v4 }
0x177e   :  { %v3815_v29 = vpop.f32.mrb[26].mxu0 }
0x177f   :  { %v3926_v6 = vsel %vm6928_vm5, -inf, %v3815_v29  ;;  %v6196_v8 = vpop.f32.mrb[27].mxu0 }
0x1780   :  { %v3934_v9 = vsel %vm736_vm4, %v3926_v6, -inf }
0x1781   :  { %3935 = vmax.xlane.f32.xlu1 %v3934_v9 }
0x1782   :  { %v3920_v55 = vpop.f32.mrb[32].mxu1 }
0x1783   :  { %v3927_v12 = vsel %vm6928_vm5, -inf, %v3920_v55  ;;  %v6201_v11 = vpop.f32.mrb[33].mxu1 }
0x1784   :  { %v3937_v17 = vsel %vm736_vm4, %v3927_v12, -inf }
0x1785   :  { %3938 = vmax.xlane.f32.xlu1 %v3937_v17 }
0x1806   :  { %v3930_v51 = vpop.xlane.xlu1 %3929 }
0x1807   :  { %v3940_v27 = vsub.f32 %v3924_v58, %v3930_v51 }
0x1809   :  { %v3944_v34 = vmul.f32 1.442695, %v3940_v27 }
0x180a   :  { %v3933_v37 = vpop.xlane.xlu0 %3932 }
0x180b   :  { %6529 = vpow2.f32 %v3944_v34  ;;  %v3941_v48 = vsub.f32 %v3925_v54, %v3933_v37 }
0x180d   :  { %v3946_v15 = vmul.f32 1.442695, %v3941_v48 }
0x180e   :  { %v3936_v20 = vpop.xlane.xlu1 %3935 }
0x180f   :  { %6531 = vpow2.f32 %v3946_v15  ;;  %v3942_v21 = vsub.f32 %v3926_v6, %v3936_v20 }
0x1811   :  { %v3948_v45 = vmul.f32 1.442695, %v3942_v21 }
0x1812   :  { %v3939_v46 = vpop.xlane.xlu1 %3938 }
0x1813   :  { %6533 = vpow2.f32 %v3948_v45  ;;  %v3943_v10 = vsub.f32 %v3927_v12, %v3939_v46 }
0x1815   :  { %v6530_v26 = vpop.eup %6529  ;;  %v3950_v35 = vmul.f32 1.442695, %v3943_v10 }
0x1816   :  { %v3952_v38 = vsel %vm736_vm4, %v6530_v26, 0.0 }
0x1817   :  { %6535 = vpow2.f32 %v3950_v35  ;;  %3953 = vadd.xlane.f32.xlu1 %v3952_v38 }
0x1819   :  { %v6532_v41 = vpop.eup %6531 }
0x181a   :  { %v3955_v58 = vsel %vm736_vm4, %v6532_v41, 0.0 }
0x181b   :  { %3956 = vadd.xlane.f32.xlu1 %v3955_v58 }
0x181d   :  { %v6534_v59 = vpop.eup %6533 }
0x181e   :  { %v3958_v60 = vsel %vm736_vm4, %v6534_v59, 0.0 }
0x181f   :  { %3959 = vadd.xlane.f32.xlu1 %v3958_v60 }
0x1821   :  { %v6536_v0 = vpop.eup %6535 }
0x1822   :  { %v3961_v54 = vsel %vm736_vm4, %v6536_v0, 0.0 }
0x1823   :  { %3962 = vadd.xlane.f32.xlu1 %v3961_v54 }
0x18a4   :  { %v3954_v63 = vpop.xlane.xlu1 %3953 }
0x18a5   :  { %6537 = vrcp.f32 %v3954_v63 }
0x18a8   :  { %v3957_v4 = vpop.xlane.xlu1 %3956 }
0x18a9   :  { %6539 = vrcp.f32 %v3957_v4 }
0x18ac   :  { %v3960_v29 = vpop.xlane.xlu1 %3959 }
0x18ad   :  { %6541 = vrcp.f32 %v3960_v29 }
0x18af   :  { %v6538_v6 = vpop.eup %6537 }
0x18b0   :  { %v3968_v8 = vmul.f32 %v6538_v6, %v6530_v26  ;;  %v3963_v9 = vpop.xlane.xlu1 %3962 }
0x18b1   :  { %6543 = vrcp.f32 %v3963_v9 }
0x18b2   :  { %6203 = vmatpush3.xpose.msk.msra.mxu0 %vm736_vm4, %v3968_v8 }
0x18b3   :  { %v6540_v55 = vpop.eup %6539  ;;  %6212 = vmatprep.subr.mxu0 %v6704_v7 }
0x18b4   :  { %v3969_v12 = vmul.f32 %v6540_v55, %v6532_v41 }
0x18b5   :  { %6205 = vmatmul.mubr.msk.f32.vlgmr.msra.gmra.mrb[28].mxu0 %vm736_vm4, %v7269_v30 }
0x18b6   :  { %6208 = vmatpush3.xpose.msk.msra.mxu1 %vm736_vm4, %v3969_v12  ;;  %6214 = vmatprep.mubr.msk.f32.mxu0 %vm6703_vm0, %v6704_v7 }
0x18b7   :  { %v6542_v11 = vpop.eup %6541  ;;  %6217 = vmatprep.subr.mxu1 %v6704_v7 }
0x18b8   :  { %v3970_v17 = vmul.f32 %v6542_v11, %v6534_v59 }
0x18b9   :  { %6210 = vmatmul.mubr.msk.f32.vlgmr.msra.gmra.mrb[34].mxu1 %vm736_vm4, %v7274_v24 }
0x18ba   :  { %6213 = vmatpush3.xpose.msk.msra.mxu0 %vm736_vm4, %v3970_v17  ;;  %6219 = vmatprep.mubr.msk.f32.mxu1 %vm6703_vm0, %v6704_v7 }
0x18bb   :  { %v6544_v51 = vpop.eup %6543  ;;  %6412 = vmatprep.subr.bf16.mxu0 %v6702_v1 }
0x18bc   :  { %v3971_v30 = vmul.f32 %v6544_v51, %v6536_v0 }
0x18bd   :  { %6215 = vmatmul.mubr.msk.f32.vlgmr.msra.gmra.mrb[30].mxu0 %vm736_vm4, %v7277_v18 }
0x18be   :  { %6218 = vmatpush3.xpose.msk.msra.mxu1 %vm736_vm4, %v3971_v30  ;;  %6414 = vmatpush3.bf16.msra.mxu0 %v6975_v23 }
0x18bf   :  { %6415 = vmatprep.subr.bf16.mxu0 %v6702_v1  ;;  %6230 = vmatprep.mubr.msk.f32.mxu0 %vm6703_vm0, %v6704_v7 }
0x18c0   :  { %6418 = vmatprep.subr.bf16.mxu1 %v6702_v1 }
0x18c1   :  { %6220 = vmatmul.mubr.msk.f32.vlgmr.msra.gmra.mrb[36].mxu1 %vm736_vm4, %v7280_v19 }
0x18c2   :  { %6417 = vmatpush3.bf16.msra.mxu0 %v6979_v40  ;;  %6420 = vmatpush3.bf16.msra.mxu1 %v7000_v47 }
0x18c3   :  { %6421 = vmatprep.subr.bf16.mxu1 %v6702_v1  ;;  %6241 = vmatprep.mubr.msk.f32.mxu1 %vm6703_vm0, %v6704_v7 }
0x18c4   :  { %6424 = vmatprep.subr.bf16.mxu0 %v6702_v1 }
0x18c6   :  { %6423 = vmatpush3.bf16.msra.mxu1 %v7004_v52 }
0x18c7   :  { %6255 = vmatprep.subr.mxu1 %v6704_v7 }
0x1988   :  { %v4044_v23 = vpop.f32.mrb[28].mxu0 }
0x1989   :  { %4276 = vxpose.xlu1.b32.start [1/4] (short) (narrow) %v4044_v23, 8  ;;  %v6206_v24 = vpop.f32.mrb[29].mxu0 }
0x198c   :  { %v4120_v18 = vpop.f32.mrb[34].mxu1 }
0x198d   :  { %4277 = vxpose.xlu1.b32.cont [2/4] (short) (narrow) %v4120_v18, 8  ;;  %v6211_v19 = vpop.f32.mrb[35].mxu1 }
0x1990   :  { %v4196_v40 = vpop.f32.mrb[30].mxu0 }
0x1991   :  { %v6216_v27 = vpop.f32.mrb[31].mxu0  ;;  %4278 = vxpose.xlu1.b32.cont [3/4] (short) (narrow) %v4196_v40, 8 }
0x1994   :  { %v4272_v47 = vpop.f32.mrb[36].mxu1 }
0x1995   :  { %4279 = vxpose.xlu1.b32.end [4/4] (short) (narrow) %v4272_v47, 8  ;;  %v6221_v34 = vpop.f32.mrb[37].mxu1 }
0x1a09   :  { %v4292_v37 = vpop.trf.xlu1 }
0x1a0a   :  { %v4308_v48 = vadd.f32 %v7255_v42, %v4292_v37 }
0x1a0c   :  { %v4309_v15 = vsel %vm594_vm3, %v4308_v48, 0.0 }
0x1a0d   :  { %4310 = vadd.xlane.f32.xlu0 %v4309_v15 }
0x1a9a   :  { %v4311_v52 = vpop.xlane.xlu0 %4310 }
0x1a9b   :  { %v4312_v20 = vmul.f32 0.03125, %v4311_v52 }
0x1a9d   :  { %v4313_v21 = vsub.f32 %v4308_v48, %v4312_v20 }
0x1a9f   :  { %v4314_v45 = vmul.f32 %v4313_v21, %v4313_v21 }
0x1aa1   :  { %v4315_v46 = vsel %vm594_vm3, %v4314_v45, 0.0 }
0x1aa2   :  { %4316 = vadd.xlane.f32.xlu0 %v4315_v46 }
0x1b2f   :  { %v4317_v10 = vpop.xlane.xlu0 %4316 }
0x1b30   :  { %v4318_v26 = vmul.f32 0.03125, %v4317_v10 }
0x1b32   :  { %v4319_v35 = vadd.f32 1e-05, %v4318_v26 }
0x1b34   :  { %6545 = vrsqrt.f32 %v4319_v35 }
0x1b3e   :  { %v6546_v38 = vpop.eup %6545 }
0x1b3f   :  { %v4321_v41 = vmul.f32 %v6546_v38, %v4313_v21 }
0x1b41   :  { %v4322_v58 = vmul.f32 %v4321_v41, %v6988_v32 }
0x1b43   :  { %v4323_v42 = vadd.f32 %v4322_v58, %v6993_v36 }
0x1b45   :  { %6231 = vmatmul.mubr.msk.f32.vlgmr.msra.gmra.mrb[32].mxu0 %vm594_vm3, %v4323_v42 }
0x1b46   :  { %6426 = vmatpush3.bf16.msra.mxu0 %v7027_v16  ;;  %6252 = vmatprep.mubr.msk.f32.mxu0 %vm6703_vm0, %v6704_v7 }
0x1b47   :  { %6427 = vmatprep.subr.bf16.mxu0 %v6702_v1 }
0x1b4a   :  { %6429 = vmatpush3.bf16.msra.mxu0 %v7031_v22 }
0x1b4b   :  { %6265 = vmatprep.subr.mxu0 %v6704_v7 }
0x1c18   :  { %v4393_v59 = vpop.f32.mrb[32].mxu0 }
0x1c19   :  { %v4394_v60 = vadd.f32 %v4393_v59, %v7012_v56  ;;  %v6232_v0 = vpop.f32.mrb[33].mxu0 }
0x1c1b   :  { %v5741_v32 = vmul.f32 -1.442695, %v4394_v60 }
0x1c1d   :  { %6547 = vpow2.f32 %v5741_v32 }
0x1c27   :  { %v6548_v36 = vpop.eup %6547 }
0x1c28   :  { %v4400_v54 = vadd.f32 1.0, %v6548_v36 }
0x1c2a   :  { %6549 = vrcp.f32 %v4400_v54 }
0x1c34   :  { %v6550_v63 = vpop.eup %6549 }
0x1c35   :  { %v4403_v16 = vmul.f32 %v6550_v63, %v4394_v60 }
0x1c37   :  { %6242 = vmatmul.mubr.msk.f32.vlgmr.msra.gmra.mrb[38].mxu1 %vm594_vm3, %v4403_v16 }
0x1c38   :  { %6257 = vmatprep.mubr.msk.f32.mxu1 %vm6703_vm0, %v6704_v7 }
0x1d0a   :  { %v4473_v4 = vpop.f32.mrb[38].mxu1 }
0x1d0b   :  { %v4474_v22 = vadd.f32 %v4473_v4, %v7022_v2  ;;  %v6243_v29 = vpop.f32.mrb[39].mxu1 }
0x1d0d   :  { %v4477_v6 = vadd.f32 %v4474_v22, %v4323_v42 }
0x1d0f   :  { %v4478_v56 = vsel %vm594_vm3, %v4477_v6, 0.0 }
0x1d10   :  { %4479 = vadd.xlane.f32.xlu0 %v4478_v56 }
0x1d9d   :  { %v4480_v8 = vpop.xlane.xlu0 %4479 }
0x1d9e   :  { %v4481_v9 = vmul.f32 0.03125, %v4480_v8 }
0x1da0   :  { %v4482_v55 = vsub.f32 %v4477_v6, %v4481_v9 }
0x1da2   :  { %v4483_v12 = vmul.f32 %v4482_v55, %v4482_v55 }
0x1da4   :  { %v4484_v11 = vsel %vm594_vm3, %v4483_v12, 0.0 }
0x1da5   :  { %4485 = vadd.xlane.f32.xlu0 %v4484_v11 }
0x1e32   :  { %v4486_v17 = vpop.xlane.xlu0 %4485 }
0x1e33   :  { %v4487_v51 = vmul.f32 0.03125, %v4486_v17 }
0x1e35   :  { %v4488_v30 = vadd.f32 1e-05, %v4487_v51 }
0x1e37   :  { %6551 = vrsqrt.f32 %v4488_v30 }
0x1e41   :  { %v6552_v23 = vpop.eup %6551 }
0x1e42   :  { %v4490_v24 = vmul.f32 %v6552_v23, %v4482_v55 }
0x1e44   :  { %v4491_v2 = vmul.f32 %v4490_v24, %v7040_v33 }
0x1e46   :  { %v7370_v18 = vadd.f32 %v4491_v2, %v7043_v39 }
0x1e48   :  { %6253 = vmatmul.mubr.msk.f32.vlgmr.msra.gmra.mrb[34].mxu0 %vm594_vm3, %v7370_v18 }
0x1e49   :  { %6267 = vmatprep.mubr.msk.f32.mxu0 %vm6703_vm0, %v6704_v7 }
0x1f1b   :  { %v4562_v19 = vpop.f32.mrb[34].mxu0 }
0x1f1c   :  { %v4563_v40 = vadd.f32 %v4562_v19, %v7055_v50  ;;  %v6254_v27 = vpop.f32.mrb[35].mxu0 }
0x1f1e   :  { %4566 = vxpose.xlu0.b32.start.end [1/1] (short) (narrow) %v4563_v40, 32 }
0x1f9e   :  { %v7377_v47 = vpop.trf.xlu0 }
0x1f9f   :  { %6256 = vmatpush3.msra.mxu1 %v7377_v47  ;;  %v4598_v33 = vmul.f32 0.17677669, %v7377_v47 }
0x1fa0   :  { %6260 = vmatprep.subr.mxu1 %v6704_v7 }
0x1fa1   :  { %4602 = vxpose.xlu1.b32.start.end [1/1] (short) (narrow) %v4598_v33, 8 }
0x1fa2   :  { %v7382_v39 = vpop.trf.xlu0 }
0x1fa3   :  { %v4599_v34 = vmul.f32 0.17677669, %v7382_v39 }
0x1fa5   :  { %4707 = vxpose.xlu0.b32.start.end [1/1] (short) (narrow) %v4599_v34, 8 }
0x1fa6   :  { %v7385_v37 = vpop.trf.xlu0 }
0x1fa7   :  { %6266 = vmatpush3.msra.mxu0 %v7385_v37  ;;  %v4600_v50 = vmul.f32 0.17677669, %v7385_v37 }
0x1fa8   :  { %6275 = vmatprep.subr.mxu0 %v6704_v7 }
0x1fa9   :  { %4812 = vxpose.xlu1.b32.start.end [1/1] (short) (narrow) %v4600_v50, 8 }
0x1faa   :  { %v7390_v48 = vpop.trf.xlu0 }
0x1fab   :  { %v4601_v15 = vmul.f32 0.17677669, %v7390_v48 }
0x1fad   :  { %4917 = vxpose.xlu1.b32.start.end [1/1] (short) (narrow) %v4601_v15, 8 }
0x2021   :  { %v4618_v52 = vpop.trf.xlu1 }
0x2022   :  { %6258 = vmatmul.mubr.msk.f32.vlgmr.msra.gmra.mrb[40].mxu1 %vm736_vm4, %v4618_v52 }
0x2023   :  { %6261 = vmatpush3.msra.mxu1 %v7382_v39  ;;  %6262 = vmatprep.mubr.msk.f32.mxu1 %vm6703_vm0, %v6704_v7 }
0x2024   :  { %6270 = vmatprep.subr.mxu1 %v6704_v7 }
0x2025   :  { %v4723_v20 = vpop.trf.xlu0 }
0x2026   :  { %6263 = vmatmul.mubr.msk.f32.vlgmr.msra.gmra.mrb[42].mxu1 %vm736_vm4, %v4723_v20 }
0x2027   :  { %6271 = vmatpush3.msra.mxu1 %v7390_v48  ;;  %6272 = vmatprep.mubr.msk.f32.mxu1 %vm6703_vm0, %v6704_v7 }
0x2028   :  { %6280 = vmatprep.subr.mxu1 %v6704_v7 }
0x2029   :  { %v4828_v21 = vpop.trf.xlu1 }
0x202a   :  { %6268 = vmatmul.mubr.msk.f32.vlgmr.msra.gmra.mrb[36].mxu0 %vm736_vm4, %v4828_v21 }
0x202b   :  { %6277 = vmatprep.mubr.msk.f32.mxu0 %vm6703_vm0, %v6704_v7 }
0x202d   :  { %v4933_v45 = vpop.trf.xlu1 }
0x202e   :  { %6273 = vmatmul.mubr.msk.f32.vlgmr.msra.gmra.mrb[44].mxu1 %vm736_vm4, %v4933_v45 }
0x202f   :  { %6282 = vmatprep.mubr.msk.f32.mxu1 %vm6703_vm0, %v6704_v7 }
0x20f5   :  { %v4703_v46 = vpop.f32.mrb[40].mxu1 }
0x20f6   :  { %v5022_v10 = vsel %vm6928_vm5, -inf, %v4703_v46  ;;  %v6259_v26 = vpop.f32.mrb[41].mxu1 }
0x20f7   :  { %v5026_v35 = vsel %vm736_vm4, %v5022_v10, -inf }
0x20f8   :  { %5027 = vmax.xlane.f32.xlu1 %v5026_v35 }
0x20f9   :  { %v4808_v38 = vpop.f32.mrb[42].mxu1 }
0x20fa   :  { %v5023_v41 = vsel %vm6928_vm5, -inf, %v4808_v38  ;;  %v6264_v58 = vpop.f32.mrb[43].mxu1 }
0x20fb   :  { %v5029_v42 = vsel %vm736_vm4, %v5023_v41, -inf }
0x20fc   :  { %5030 = vmax.xlane.f32.xlu0 %v5029_v42 }
0x20fd   :  { %v4913_v59 = vpop.f32.mrb[36].mxu0 }
0x20fe   :  { %v5024_v60 = vsel %vm6928_vm5, -inf, %v4913_v59  ;;  %v6269_v0 = vpop.f32.mrb[37].mxu0 }
0x20ff   :  { %v5032_v32 = vsel %vm736_vm4, %v5024_v60, -inf }
0x2100   :  { %5033 = vmax.xlane.f32.xlu1 %v5032_v32 }
0x2101   :  { %v5018_v36 = vpop.f32.mrb[44].mxu1 }
0x2102   :  { %v5025_v54 = vsel %vm6928_vm5, -inf, %v5018_v36  ;;  %v6274_v63 = vpop.f32.mrb[45].mxu1 }
0x2103   :  { %v5035_v16 = vsel %vm736_vm4, %v5025_v54, -inf }
0x2104   :  { %5036 = vmax.xlane.f32.xlu1 %v5035_v16 }
0x2185   :  { %v5028_v4 = vpop.xlane.xlu1 %5027 }
0x2186   :  { %v5038_v22 = vsub.f32 %v5022_v10, %v5028_v4 }
0x2188   :  { %v5042_v29 = vmul.f32 1.442695, %v5038_v22 }
0x2189   :  { %v5031_v6 = vpop.xlane.xlu0 %5030 }
0x218a   :  { %6553 = vpow2.f32 %v5042_v29  ;;  %v5039_v56 = vsub.f32 %v5023_v41, %v5031_v6 }
0x218c   :  { %v5044_v8 = vmul.f32 1.442695, %v5039_v56 }
0x218d   :  { %v5034_v9 = vpop.xlane.xlu1 %5033 }
0x218e   :  { %6555 = vpow2.f32 %v5044_v8  ;;  %v5040_v55 = vsub.f32 %v5024_v60, %v5034_v9 }
0x2190   :  { %v5046_v12 = vmul.f32 1.442695, %v5040_v55 }
0x2191   :  { %v5037_v11 = vpop.xlane.xlu1 %5036 }
0x2192   :  { %6557 = vpow2.f32 %v5046_v12  ;;  %v5041_v17 = vsub.f32 %v5025_v54, %v5037_v11 }
0x2194   :  { %v6554_v61 = vpop.eup %6553  ;;  %v5048_v51 = vmul.f32 1.442695, %v5041_v17 }
0x2195   :  { %v5050_v30 = vsel %vm736_vm4, %v6554_v61, 0.0 }
0x2196   :  { %6559 = vpow2.f32 %v5048_v51  ;;  %5051 = vadd.xlane.f32.xlu1 %v5050_v30 }
0x2198   :  { %v6556_v23 = vpop.eup %6555 }
0x2199   :  { %v5053_v24 = vsel %vm736_vm4, %v6556_v23, 0.0 }
0x219a   :  { %5054 = vadd.xlane.f32.xlu0 %v5053_v24 }
0x219c   :  { %v6558_v2 = vpop.eup %6557 }
0x219d   :  { %v5056_v19 = vsel %vm736_vm4, %v6558_v2, 0.0 }
0x219e   :  { %5057 = vadd.xlane.f32.xlu1 %v5056_v19 }
0x21a0   :  { %v6560_v40 = vpop.eup %6559 }
0x21a1   :  { %v5059_v27 = vsel %vm736_vm4, %v6560_v40, 0.0 }
0x21a2   :  { %5060 = vadd.xlane.f32.xlu0 %v5059_v27 }
0x2223   :  { %v5052_v33 = vpop.xlane.xlu1 %5051 }
0x2224   :  { %6561 = vrcp.f32 %v5052_v33 }
0x2227   :  { %v5055_v34 = vpop.xlane.xlu0 %5054 }
0x2228   :  { %6563 = vrcp.f32 %v5055_v34 }
0x222b   :  { %v5058_v50 = vpop.xlane.xlu1 %5057 }
0x222c   :  { %6565 = vrcp.f32 %v5058_v50 }
0x222e   :  { %v6562_v15 = vpop.eup %6561 }
0x222f   :  { %v5066_v52 = vmul.f32 %v6562_v15, %v6554_v61  ;;  %v5061_v20 = vpop.xlane.xlu0 %5060 }
0x2230   :  { %6567 = vrcp.f32 %v5061_v20 }
0x2231   :  { %6276 = vmatpush3.xpose.msk.msra.mxu0 %vm736_vm4, %v5066_v52 }
0x2232   :  { %v6564_v21 = vpop.eup %6563  ;;  %6285 = vmatprep.subr.mxu0 %v6704_v7 }
0x2233   :  { %v5067_v45 = vmul.f32 %v6564_v21, %v6556_v23 }
0x2234   :  { %6278 = vmatmul.mubr.msk.f32.vlgmr.msra.gmra.mrb[38].mxu0 %vm736_vm4, %v7377_v47 }
0x2235   :  { %6281 = vmatpush3.xpose.msk.msra.mxu1 %vm736_vm4, %v5067_v45  ;;  %6287 = vmatprep.mubr.msk.f32.mxu0 %vm6703_vm0, %v6704_v7 }
0x2236   :  { %v6566_v46 = vpop.eup %6565  ;;  %6290 = vmatprep.subr.mxu1 %v6704_v7 }
0x2237   :  { %v5068_v10 = vmul.f32 %v6566_v46, %v6558_v2 }
0x2238   :  { %6283 = vmatmul.mubr.msk.f32.vlgmr.msra.gmra.mrb[46].mxu1 %vm736_vm4, %v7382_v39 }
0x2239   :  { %6286 = vmatpush3.xpose.msk.msra.mxu0 %vm736_vm4, %v5068_v10  ;;  %6292 = vmatprep.mubr.msk.f32.mxu1 %vm6703_vm0, %v6704_v7 }
0x223a   :  { %v6568_v26 = vpop.eup %6567  ;;  %6430 = vmatprep.subr.bf16.mxu0 %v6702_v1 }
0x223b   :  { %v5069_v47 = vmul.f32 %v6568_v26, %v6560_v40 }
0x223c   :  { %6288 = vmatmul.mubr.msk.f32.vlgmr.msra.gmra.mrb[40].mxu0 %vm736_vm4, %v7385_v37 }
0x223d   :  { %6291 = vmatpush3.xpose.msk.msra.mxu1 %vm736_vm4, %v5069_v47  ;;  %6432 = vmatpush3.bf16.msra.mxu0 %v7136_v25 }
0x223e   :  { %6433 = vmatprep.subr.bf16.mxu0 %v6702_v1  ;;  %6303 = vmatprep.mubr.msk.f32.mxu0 %vm6703_vm0, %v6704_v7 }
0x223f   :  { %6436 = vmatprep.subr.bf16.mxu1 %v6702_v1 }
0x2240   :  { %6293 = vmatmul.mubr.msk.f32.vlgmr.msra.gmra.mrb[48].mxu1 %vm736_vm4, %v7390_v48 }
0x2241   :  { %6435 = vmatpush3.bf16.msra.mxu0 %v7140_v28  ;;  %6438 = vmatpush3.bf16.msra.mxu1 %v7161_v43 }
0x2242   :  { %6439 = vmatprep.subr.bf16.mxu1 %v6702_v1  ;;  %6314 = vmatprep.mubr.msk.f32.mxu1 %vm6703_vm0, %v6704_v7 }
0x2243   :  { %6442 = vmatprep.subr.bf16.mxu0 %v6702_v1 }
0x2245   :  { %6441 = vmatpush3.bf16.msra.mxu1 %v7165_v44 }
0x2307   :  { %v5142_v25 = vpop.f32.mrb[38].mxu0 }
0x2308   :  { %5374 = vxpose.xlu1.b32.start [1/4] (short) (narrow) %v5142_v25, 8  ;;  %v6279_v39 = vpop.f32.mrb[39].mxu0 }
0x230b   :  { %v5218_v37 = vpop.f32.mrb[46].mxu1 }
0x230c   :  { %5375 = vxpose.xlu1.b32.cont [2/4] (short) (narrow) %v5218_v37, 8  ;;  %v6284_v35 = vpop.f32.mrb[47].mxu1 }
0x230f   :  { %v5294_v48 = vpop.f32.mrb[40].mxu0 }
0x2310   :  { %v6289_v38 = vpop.f32.mrb[41].mxu0  ;;  %5376 = vxpose.xlu1.b32.cont [3/4] (short) (narrow) %v5294_v48, 8 }
0x2313   :  { %v5370_v28 = vpop.f32.mrb[48].mxu1 }
0x2314   :  { %5377 = vxpose.xlu1.b32.end [4/4] (short) (narrow) %v5370_v28, 8  ;;  %v6294_v43 = vpop.f32.mrb[49].mxu1 }
0x2388   :  { %v5390_v41 = vpop.trf.xlu1 }
0x2389   :  { %v5406_v58 = vadd.f32 %v5390_v41, %v7370_v18 }
0x238b   :  { %v5407_v42 = vsel %vm594_vm3, %v5406_v58, 0.0 }
0x238c   :  { %5408 = vadd.xlane.f32.xlu0 %v5407_v42 }
0x2419   :  { %v5409_v59 = vpop.xlane.xlu0 %5408 }
0x241a   :  { %v5410_v44 = vmul.f32 0.03125, %v5409_v59 }
0x241c   :  { %v5411_v60 = vsub.f32 %v5406_v58, %v5410_v44 }
0x241e   :  { %v5412_v0 = vmul.f32 %v5411_v60, %v5411_v60 }
0x2420   :  { %v5413_v32 = vsel %vm594_vm3, %v5412_v0, 0.0 }
0x2421   :  { %5414 = vadd.xlane.f32.xlu0 %v5413_v32 }
0x24ae   :  { %v5415_v36 = vpop.xlane.xlu0 %5414 }
0x24af   :  { %v5416_v54 = vmul.f32 0.03125, %v5415_v36 }
0x24b1   :  { %v5417_v63 = vadd.f32 1e-05, %v5416_v54 }
0x24b3   :  { %6569 = vrsqrt.f32 %v5417_v63 }
0x24bd   :  { %v6570_v16 = vpop.eup %6569 }
0x24be   :  { %v5419_v4 = vmul.f32 %v6570_v16, %v5411_v60 }
0x24c0   :  { %v5420_v22 = vmul.f32 %v5419_v4, %v7149_v57 }
0x24c2   :  { %v5421_v18 = vadd.f32 %v5420_v22, %v7154_v62 }
0x24c4   :  { %6304 = vmatmul.mubr.msk.f32.vlgmr.msra.gmra.mrb[42].mxu0 %vm594_vm3, %v5421_v18 }
0x24c5   :  { %6444 = vmatpush3.bf16.msra.mxu0 %v7222_v49  ;;  %6325 = vmatprep.mubr.msk.f32.mxu0 %vm6703_vm0, %v6704_v7 }
0x24c6   :  { %6445 = vmatprep.subr.bf16.mxu0 %v6702_v1 }
0x24c9   :  { %6447 = vmatpush3.bf16.msra.mxu0 %v7232_v5 }
0x2597   :  { %v5491_v29 = vpop.f32.mrb[42].mxu0 }
0x2598   :  { %v5492_v6 = vadd.f32 %v5491_v29, %v7172_v53  ;;  %v6305_v56 = vpop.f32.mrb[43].mxu0 }
0x259a   :  { %v5757_v8 = vmul.f32 -1.442695, %v5492_v6 }
0x259c   :  { %6571 = vpow2.f32 %v5757_v8 }
0x25a6   :  { %v6572_v57 = vpop.eup %6571 }
0x25a7   :  { %v5498_v9 = vadd.f32 1.0, %v6572_v57 }
0x25a9   :  { %6573 = vrcp.f32 %v5498_v9 }
0x25b3   :  { %v6574_v62 = vpop.eup %6573 }
0x25b4   :  { %v5501_v55 = vmul.f32 %v6574_v62, %v5492_v6 }
0x25b6   :  { %6315 = vmatmul.mubr.msk.f32.vlgmr.msra.gmra.mrb[50].mxu1 %vm594_vm3, %v5501_v55 }
0x2689   :  { %v5571_v49 = vpop.f32.mrb[50].mxu1 }
0x268a   :  { %v5572_v7 = vadd.f32 %v5571_v49, %v7211_v13  ;;  %v6316_v12 = vpop.f32.mrb[51].mxu1 }
0x268c   :  { %v5575_v1 = vadd.f32 %v5572_v7, %v5421_v18 }
0x268e   :  { %v5576_v5 = vsel %vm594_vm3, %v5575_v1, 0.0 }
0x268f   :  { %5577 = vadd.xlane.f32.xlu0 %v5576_v5 }
0x271c   :  { %v5578_v11 = vpop.xlane.xlu0 %5577 }
0x271d   :  { %v5579_v53 = vmul.f32 0.03125, %v5578_v11 }
0x271f   :  { %v5580_v17 = vsub.f32 %v5575_v1, %v5579_v53 }
0x2721   :  { %v5581_v61 = vmul.f32 %v5580_v17, %v5580_v17 }
0x2723   :  { %v5582_v51 = vsel %vm594_vm3, %v5581_v61, 0.0 }
0x2724   :  { %5583 = vadd.xlane.f32.xlu0 %v5582_v51 }
0x27b1   :  { %v5584_v30 = vpop.xlane.xlu0 %5583 }
0x27b2   :  { %v5585_v23 = vmul.f32 0.03125, %v5584_v30 }
0x27b4   :  { %v5586_v24 = vadd.f32 1e-05, %v5585_v23 }
0x27b6   :  { %6575 = vrsqrt.f32 %v5586_v24 }
0x27c0   :  { %v6576_v2 = vpop.eup %6575 }
0x27c1   :  { %v5588_v19 = vmul.f32 %v6576_v2, %v5580_v17 }
0x27c3   :  { %v5589_v13 = vmul.f32 %v5588_v19, %v7239_v3 }
0x27c5   :  { %v5590_v40 = vadd.f32 %v5589_v13, %v7244_v14 }
0x27c7   :  { %6326 = vmatmul.mubr.msk.f32.vlgmr.msra.gmra.mrb[44].mxu0 %vm594_vm3, %v5590_v40 }
0x289a   :  { %v5660_v27 = vpop.f32.mrb[44].mxu0 }
0x289b   :  { %v5661_v33 = vadd.f32 %v7265_v31, %v5660_v27  ;;  %v6327_v34 = vpop.f32.mrb[45].mxu0 }
0x289d   :  { %5665 = vst [vmem:[#allocation10 + $0x8] sm:$0xff] %v5661_v33 }
0x289e   :  { %6676 = shalt.err (!%p6673_p8)
}
0x289f   :  { %s6677_s17 = scalar_lea.hbm %s7498_s7, 256 }
0x28a0   :  { %p6678_p9 = scmp.ne.s32.totalorder %s7498_s7, %s6677_s17  ;;  %p6681_p10 = scmp.lt.u32.totalorder %s6677_s17, %s7498_s7 }
0x28a2   :  { %p6683_p11 = pnand %p6681_p10, %p6678_p9 }
0x28a4   :  { %6686 = shalt.err (!%p6683_p11)
}
0x28a5   :  { %5677 = dma.vmem_to_hbm [thread:$0]  %s5672_s1, 256, %s7498_s7, [#allocation4], %s6697_s2, %s6697_s2, %s6698_s23  }
0x28a6   :  { %6693 = dma.done.wait [#allocation4], 256  }
0x28a7   :  { %6694 = vsyncadd [#allocation4], 4294967040 }
0x28a8   :  { %5681 = vsyncpa [#allocation3], 1 }
0x28a9   :  { %5682 = vsyncpa [#allocation6], 1 }
0x28aa   :  { %5683 = vsyncpa [#allocation9], 1 }
0x28ab   :  { %5684 = vsyncpa [#allocation4], 1 }

</bundles_post_ra>
